<compile_context>
chip_gen: v7x
topology: tpu7x:2x2x1
jax: 0.10.0
libtpu: 0.0.40
codegen_flags: <defaults>
</compile_context>

<pallas_src>
import numpy as np
import jax
import jax.numpy as jnp
from jax.experimental import pallas as pl
from jax.experimental.pallas import tpu as pltpu

# ----- small synthetic hyper-parameters (scaled down from the module's 2048-fft / 128-mel) -----
N_FFT = 128
HOP = N_FFT // 2          # torchaudio MelSpectrogram default hop = n_fft // 2
N_FREQ = N_FFT // 2 + 1   # 65
FREQ_PAD = 128            # pad freq axis to a full 128-lane tile
N_MELS = 32
SAMPLE_RATE = 16000
IN_CHAN = 1               # 'mono' config -> in_chan = 1
CONV1_C, CONV2_C = 16, 32
HIDDEN = 64               # self.lstm_units
N_CLASSES = 10
BN_EPS = 1e-5
COL_BLK = 512             # conv output column tile (review: 512-2048, ~85% HBM roofline)
SPEC_BLK = 512            # spec/mel frame-column tile
BBLK = 8                  # batch block = one full sublane group


def _round_up(x, m):
    return ((x + m - 1) // m) * m


# ============================== Pallas kernels ==============================

def spec_mel_kernel(framesT_ref, dft_ref, melT_ref, out_ref):
    """Transposed STFT->power->mel so the OUTPUT last dim is the (large) frame axis.
    framesT (n_fft, Nblk) bf16, dft (2*FREQ_PAD, n_fft) bf16 rows=[w*cos ; -w*sin],
    melT (N_MELS, FREQ_PAD) bf16 -> out (N_MELS, Nblk) f32 (lane-dense stores)."""
    c = jnp.dot(dft_ref[...], framesT_ref[...], preferred_element_type=jnp.float32)
    re = c[:FREQ_PAD, :]
    im = c[FREQ_PAD:, :]
    power = (re * re + im * im).astype(jnp.bfloat16)       # ComplexNorm(power=2.0)
    out_ref[...] = jnp.dot(melT_ref[...], power, preferred_element_type=jnp.float32)


def whiten_kernel(x_ref, o_ref):
    """SpecNormalization('whiten'): (x - mean) / std, unbiased std over non-batch dims."""
    x = x_ref[...]
    d = x.shape[1]
    mean = jnp.mean(x, axis=1, keepdims=True)
    diff = x - mean
    var = jnp.sum(diff * diff, axis=1, keepdims=True) / float(d - 1)
    o_ref[...] = diff * jax.lax.rsqrt(var + 1e-12)


def conv_bn_relu_pool_kernel(w_ref, c00_ref, c01_ref, c10_ref, c11_ref,
                             scale_ref, bias_ref, o_ref):
    """Conv3x3 + folded BN + ReLU + FUSED 2x2 maxpool.
    Four im2col matrices (one per pooling-window position) -> four (c_out, blk) matmuls,
    per-position scale/bias/ReLU, elementwise max.  Output is already pooled (4x less HBM
    writeback) and lane-dense; stored in bf16."""
    w = w_ref[...]
    scale = scale_ref[...]
    bias = bias_ref[...]

    def act(cref):
        a = jnp.dot(w, cref[...], preferred_element_type=jnp.float32)
        return jnp.maximum(a * scale + bias, 0.0)

    m = act(c00_ref)
    m = jnp.maximum(m, act(c01_ref))
    m = jnp.maximum(m, act(c10_ref))
    m = jnp.maximum(m, act(c11_ref))
    o_ref[...] = m.astype(o_ref.dtype)


def crnn_recur_dense_kernel(xseq_ref, wih1_ref, whh1_ref, b1_ref,
                            w2cat_ref, b2_ref, len_ref, dw_ref, db_ref,
                            o_ref, gx_scr):
    """Fused: hoisted layer-1 input projection (one big matmul over the whole sequence),
    2-layer LSTM recurrence (merged layer-2 matmul, (i,f,o,g) gate order, unrolled loop),
    many-to-one readout at lengths-1, dense + log_softmax."""
    T, Bb, F = xseq_ref.shape
    H = whh1_ref.shape[0]

    # --- hoisted input-to-hidden projection: one (T*Bb, F) x (F, 4H) matmul ---
    x2d = xseq_ref[...].reshape(T * Bb, F)                       # Bb == 8 -> trivial reshape
    gx = jnp.dot(x2d, wih1_ref[...], preferred_element_type=jnp.float32) + b1_ref[...]
    gx_scr[...] = gx.reshape(T, Bb, 4 * H)

    lens = len_ref[...]                                          # (Bb, 1) int32
    b2 = jnp.broadcast_to(b2_ref[...], (Bb, 4 * H))              # hoisted (no per-step bcast)

    def gate_math(gates, c_prev):
        # gate columns pre-permuted at parameter-prep time to (i, f, o, g):
        # ONE sigmoid over a contiguous (Bb, 3H) slab + ONE tanh over (Bb, H).
        s = jax.nn.sigmoid(gates[:, :3 * H])
        i = s[:, 0:H]
        f = s[:, H:2 * H]
        o = s[:, 2 * H:3 * H]
        g = jnp.tanh(gates[:, 3 * H:4 * H])
        c = f * c_prev + i * g
        return o * jnp.tanh(c), c

    def step(t, carry):
        h1, c1, h2, c2, last = carry
        # layer 1: only the small hidden matmul remains per step
        g1 = gx_scr[t] + jnp.dot(h1.astype(jnp.bfloat16), whh1_ref[...],
                                 preferred_element_type=jnp.float32)
        h1, c1 = gate_math(g1, c1)
        # layer 2: ONE merged ( [h1 ; h2] @ [W_ih2 ; W_hh2] ) matmul on the serial path
        hcat = jnp.concatenate([h1, h2], axis=1).astype(jnp.bfloat16)
        g2 = jnp.dot(hcat, w2cat_ref[...], preferred_element_type=jnp.float32) + b2
        h2, c2 = gate_math(g2, c2)
        # _many_to_one: capture h2 at t == length-1 (causal, so padding can't affect it;
        # padded batch rows have lens==0 and keep last==0)
        last = jnp.where(lens == t + 1, h2, last)
        return h1, c1, h2, c2, last

    z = jnp.zeros((Bb, H), jnp.float32)
    _, _, _, _, last = jax.lax.fori_loop(0, T, step, (z, z, z, z, z), unroll=2)

    # dense + log_softmax epilogue (fused: no extra kernel launch / HBM round trip)
    logits = (jnp.dot(last.astype(jnp.bfloat16), dw_ref[...],
                      preferred_element_type=jnp.float32) + db_ref[...])
    m = jnp.max(logits, axis=1, keepdims=True)
    zl = logits - m
    o_ref[...] = zl - jnp.log(jnp.sum(jnp.exp(zl), axis=1, keepdims=True))


# ============================== pallas_call wrappers ==============================

def mel_spectrogram(frames2d, dft_catT, mel_T):
    """frames2d (N, n_fft) bf16 -> (N_MELS, N) f32, computed transposed for lane-dense
    output stores, column-tiled on a 'parallel' grid."""
    N = frames2d.shape[0]
    framesT = frames2d.T                                         # (n_fft, N)
    blk = SPEC_BLK if N >= SPEC_BLK else _round_up(N, 128)
    n_pad = _round_up(N, blk)
    framesT = jnp.pad(framesT, ((0, 0), (0, n_pad - N)))
    out = pl.pallas_call(
        spec_mel_kernel,
        out_shape=jax.ShapeDtypeStruct((N_MELS, n_pad), jnp.float32),
        grid=(n_pad // blk,),
        in_specs=[
            pl.BlockSpec((N_FFT, blk), lambda j: (0, j)),
            pl.BlockSpec((2 * FREQ_PAD, N_FFT), lambda j: (0, 0)),
            pl.BlockSpec((N_MELS, FREQ_PAD), lambda j: (0, 0)),
        ],
        out_specs=pl.BlockSpec((N_MELS, blk), lambda j: (0, j)),
        compiler_params=pltpu.CompilerParams(dimension_semantics=("parallel",)),
    )(framesT, dft_catT, mel_T)
    return out[:, :N]


def whiten(flat):
    """Whole-array whiten; B rows only, tiny.  TODO(synk): row-tile + vmem_limit_bytes at
    production sizes (v7x 64 MiB VMEM) and to shard across 2 TCs."""
    return pl.pallas_call(
        whiten_kernel,
        out_shape=jax.ShapeDtypeStruct(flat.shape, jnp.float32),
    )(flat)


def im2col_pool_T(x, p, q):
    """x (C, B, H, W) bf16 -> (C*9, B*H2*W2) bf16; column (b,i,j) holds the 3x3 patch feeding
    conv output position (2i+p, 2j+q) so the 2x2 maxpool can be fused in-kernel.
    TODO(synk): replace im2col with an in-kernel 9-shifted-matmul conv at production sizes."""
    C, B, H, W = x.shape
    H2, W2 = H // 2, W // 2
    xp = jnp.pad(x, ((0, 0), (0, 0), (1, 1), (1, 1)))
    patches = [xp[:, :, p + kh:p + kh + 2 * H2:2, q + kw:q + kw + 2 * W2:2]
               for kh in range(3) for kw in range(3)]
    return jnp.stack(patches, axis=1).reshape(C * 9, B * H2 * W2)


def conv_block(x_cbhw, wmat, scale, bias):
    """Conv3x3 (pad 1) + folded BN + ReLU + fused 2x2 maxpool.
    Activations (C, B, H, W) bf16 -> pooled (c_out, B, H//2, W//2) bf16."""
    C, B, H, W = x_cbhw.shape
    c_out, kdim = wmat.shape
    H2, W2 = H // 2, W // 2
    n_cols = B * H2 * W2
    cols4 = [im2col_pool_T(x_cbhw, p, q) for p in (0, 1) for q in (0, 1)]
    blk = COL_BLK if n_cols >= COL_BLK else _round_up(n_cols, 128)
    n_pad = _round_up(n_cols, blk)
    cols4 = [jnp.pad(c, ((0, 0), (0, n_pad - n_cols))) for c in cols4]
    col_spec = pl.BlockSpec((kdim, blk), lambda j: (0, j))
    out2d = pl.pallas_call(
        conv_bn_relu_pool_kernel,
        out_shape=jax.ShapeDtypeStruct((c_out, n_pad), jnp.bfloat16),
        grid=(n_pad // blk,),
        in_specs=[
            pl.BlockSpec((c_out, kdim), lambda j: (0, 0)),
            col_spec, col_spec, col_spec, col_spec,
            pl.BlockSpec((c_out, 1), lambda j: (0, 0)),
            pl.BlockSpec((c_out, 1), lambda j: (0, 0)),
        ],
        out_specs=pl.BlockSpec((c_out, blk), lambda j: (0, j)),
        compiler_params=pltpu.CompilerParams(dimension_semantics=("parallel",)),
    )(wmat, *cols4, scale, bias)
    return out2d[:, :n_cols].reshape(c_out, B, H2, W2)


def crnn_recur_dense(xseq, params, lengths):
    """Fused 2-layer LSTM + many-to-one + dense + log_softmax.  Batch padded to a full
    8-sublane group and tiled on a 'parallel' batch grid axis (v7x 2-TC)."""
    T, B, F = xseq.shape
    Bp = _round_up(max(B, BBLK), BBLK)
    xseq_p = jnp.pad(xseq, ((0, 0), (0, Bp - B), (0, 0)))
    lens_p = jnp.pad(lengths.astype(jnp.int32), (0, Bp - B)).reshape(Bp, 1)
    out = pl.pallas_call(
        crnn_recur_dense_kernel,
        out_shape=jax.ShapeDtypeStruct((Bp, N_CLASSES), jnp.float32),
        grid=(Bp // BBLK,),
        in_specs=[
            pl.BlockSpec((T, BBLK, F), lambda j: (0, j, 0)),
            pl.BlockSpec((F, 4 * HIDDEN), lambda j: (0, 0)),
            pl.BlockSpec((HIDDEN, 4 * HIDDEN), lambda j: (0, 0)),
            pl.BlockSpec((1, 4 * HIDDEN), lambda j: (0, 0)),
            pl.BlockSpec((2 * HIDDEN, 4 * HIDDEN), lambda j: (0, 0)),
            pl.BlockSpec((1, 4 * HIDDEN), lambda j: (0, 0)),
            pl.BlockSpec((BBLK, 1), lambda j: (j, 0)),
            pl.BlockSpec((HIDDEN, N_CLASSES), lambda j: (0, 0)),
            pl.BlockSpec((1, N_CLASSES), lambda j: (0, 0)),
        ],
        out_specs=pl.BlockSpec((BBLK, N_CLASSES), lambda j: (j, 0)),
        scratch_shapes=[pltpu.VMEM((T, BBLK, 4 * HIDDEN), jnp.float32)],
        compiler_params=pltpu.CompilerParams(dimension_semantics=("parallel",)),
    )(xseq_p, params["lstm1_wih"], params["lstm1_whh"], params["lstm1_b"],
      params["lstm2_wcat"], params["lstm2_b"], lens_p,
      params["dense_w"], params["dense_b"])
    return out[:B]


# ============================== plain-JAX glue ==============================

def hann_window(n):
    return 0.5 * (1.0 - np.cos(2.0 * np.pi * np.arange(n) / n))   # periodic (torch default)


def mel_filterbank(n_freq, n_mels, sample_rate):
    # HTK mel scale, no normalization (torchaudio MelScale defaults)
    def hz2mel(f): return 2595.0 * np.log10(1.0 + f / 700.0)
    def mel2hz(m): return 700.0 * (10.0 ** (m / 2595.0) - 1.0)
    f_pts = mel2hz(np.linspace(hz2mel(0.0), hz2mel(sample_rate / 2.0), n_mels + 2))
    all_freqs = np.linspace(0.0, sample_rate / 2.0, n_freq)
    f_diff = f_pts[1:] - f_pts[:-1]
    slopes = f_pts[None, :] - all_freqs[:, None]
    down = -slopes[:, :-2] / np.maximum(f_diff[:-1], 1e-8)
    up = slopes[:, 2:] / np.maximum(f_diff[1:], 1e-8)
    return np.maximum(0.0, np.minimum(down, up)).astype(np.float32)   # (n_freq, n_mels)


def dft_mel_matrices():
    """Transposed, zero-padded (2*FREQ_PAD, n_fft) windowed [cos ; -sin] DFT matrix and
    (N_MELS, FREQ_PAD) mel filterbank; zero rows/cols are free on the MXU and keep every
    slice 128-aligned.  bf16 operands (f32 accumulation in-kernel)."""
    n = np.arange(N_FFT)[:, None]
    k = np.arange(N_FREQ)[None, :]
    ang = 2.0 * np.pi * n * k / N_FFT
    w = hann_window(N_FFT)[:, None]
    dr = (w * np.cos(ang)).astype(np.float32)        # (n_fft, 65)
    di = (-w * np.sin(ang)).astype(np.float32)
    dftT = np.zeros((2 * FREQ_PAD, N_FFT), np.float32)
    dftT[:N_FREQ, :] = dr.T
    dftT[FREQ_PAD:FREQ_PAD + N_FREQ, :] = di.T
    mel = mel_filterbank(N_FREQ, N_MELS, SAMPLE_RATE)
    melT = np.zeros((N_MELS, FREQ_PAD), np.float32)
    melT[:, :N_FREQ] = mel.T
    return dftT, melT


def frame_signal(x, n_fft, hop):
    # x: (B, C, L); torch.stft(center=True, pad_mode='reflect')
    pad = n_fft // 2
    xp = jnp.pad(x, ((0, 0), (0, 0), (pad, pad)), mode="reflect")
    n_frames = 1 + x.shape[-1] // hop
    idx = np.arange(n_frames)[:, None] * hop + np.arange(n_fft)[None, :]
    return xp[:, :, idx]                                              # (B, C, T, n_fft)


# ============================== parameters ==============================

def reorder_gates(w):
    """Permute LSTM gate columns from PyTorch's (i, f, g, o) to (i, f, o, g) so the kernel
    does one contiguous 3H sigmoid + one H tanh (offline, zero runtime cost)."""
    i, f, g, o = jnp.split(w, 4, axis=-1)
    return jnp.concatenate([i, f, o, g], axis=-1)


def init_params(key):
    ks = jax.random.split(key, 22)

    def u(k, shape, s):
        return jax.random.uniform(k, shape, jnp.float32, -s, s)

    p = {}
    dftT, melT = dft_mel_matrices()
    # bf16 MXU operands (review item); whitening downstream makes bf16 spectrogram OK.
    p["dft_catT"] = jnp.asarray(dftT, dtype=jnp.bfloat16)
    p["mel_fbT"] = jnp.asarray(melT, dtype=jnp.bfloat16)

    def conv_bn(kw, kb, kg, kbe, km, kv, c_in, c_out):
        s = 1.0 / np.sqrt(c_in * 9)
        w = u(kw, (c_out, c_in, 3, 3), s)
        b = u(kb, (c_out,), s)
        gamma = jax.random.uniform(kg, (c_out,), jnp.float32, 0.5, 1.5)
        beta = u(kbe, (c_out,), 0.5)
        rmean = u(km, (c_out,), 0.5)
        rvar = jax.random.uniform(kv, (c_out,), jnp.float32, 0.5, 1.5)
        eff_scale = gamma / jnp.sqrt(rvar + BN_EPS)
        eff_bias = (b - rmean) * eff_scale + beta
        wmat = w.reshape(c_out, c_in * 9).astype(jnp.bfloat16)     # bf16 MXU operand
        return wmat, eff_scale.reshape(c_out, 1), eff_bias.reshape(c_out, 1)

    p["w1"], p["scale1"], p["bias1"] = conv_bn(*ks[0:6], IN_CHAN, CONV1_C)
    p["w2"], p["scale2"], p["bias2"] = conv_bn(*ks[6:12], CONV1_C, CONV2_C)

    feat = (N_MELS // 4) * CONV2_C                     # conv output (height * channels)
    sl = 1.0 / np.sqrt(HIDDEN)
    wih1 = u(ks[12], (feat, 4 * HIDDEN), sl)
    whh1 = u(ks[13], (HIDDEN, 4 * HIDDEN), sl)
    b1 = u(ks[14], (1, 4 * HIDDEN), sl) + u(ks[15], (1, 4 * HIDDEN), sl)   # b_ih + b_hh
    wih2 = u(ks[16], (HIDDEN, 4 * HIDDEN), sl)
    whh2 = u(ks[17], (HIDDEN, 4 * HIDDEN), sl)
    b2 = u(ks[18], (1, 4 * HIDDEN), sl) + u(ks[19], (1, 4 * HIDDEN), sl)

    p["lstm1_wih"] = reorder_gates(wih1).astype(jnp.bfloat16)
    p["lstm1_whh"] = reorder_gates(whh1).astype(jnp.bfloat16)
    p["lstm1_b"] = reorder_gates(b1)
    # Merged layer-2 weight: one (2H, 4H) matmul per step instead of two MXU round trips.
    p["lstm2_wcat"] = reorder_gates(
        jnp.concatenate([wih2, whh2], axis=0)).astype(jnp.bfloat16)
    p["lstm2_b"] = reorder_gates(b2)

    sd = 1.0 / np.sqrt(HIDDEN)
    p["dense_w"] = u(ks[20], (HIDDEN, N_CLASSES), sd).astype(jnp.bfloat16)
    p["dense_b"] = u(ks[21], (1, N_CLASSES), sd)
    return p


# ============================== forward ==============================

def audio_crnn_forward(params, x, lengths):
    B = x.shape[0]
    xt = jnp.transpose(x.astype(jnp.float32), (0, 2, 1))              # (B, C, L)

    # ---- MelspectrogramStretch (eval: no random stretch) ----
    frames = frame_signal(xt, N_FFT, HOP)                             # (B, C, T, n_fft) f32
    _, C, T, _ = frames.shape
    frames2d = frames.reshape(B * C * T, N_FFT).astype(jnp.bfloat16)
    melT2d = mel_spectrogram(frames2d, params["dft_catT"], params["mel_fbT"])  # (N_MELS, B*C*T)
    spec = jnp.transpose(melT2d.reshape(N_MELS, B, C, T), (1, 2, 0, 3))        # (B,C,n_mels,T)

    flat = spec.reshape(B, -1)
    spec = whiten(flat).reshape(spec.shape)

    # _num_stft_bins(lengths, n_fft, hop, n_fft // 2)
    lengths = (lengths + 2 * (N_FFT // 2) - N_FFT + HOP) // HOP

    # ---- conv stack: channel-major bf16 activations, fused conv+BN+ReLU+maxpool ----
    h = jnp.transpose(spec.astype(jnp.bfloat16), (1, 0, 2, 3))        # (C, B, n_mels, T)
    h = conv_block(h, params["w1"], params["scale1"], params["bias1"])
    h = conv_block(h, params["w2"], params["scale2"], params["bias2"])

    # modify_lengths over Conv2d / MaxPool2d (time = last dim): (p, k, s)
    for (p_, k_, s_) in [(1, 3, 1), (0, 2, 2), (1, 3, 1), (0, 2, 2)]:
        lengths = (lengths + 2 * p_ - k_) // s_ + 1
    lengths = jnp.maximum(lengths, 1)

    # x = xt.transpose(1, -1).reshape(batch, time, -1): features ordered (mel_bin, channel)
    Cc, Bq, Hh, Ww = h.shape
    xseq = jnp.transpose(h, (3, 1, 2, 0)).reshape(Ww, Bq, Hh * Cc)    # (T_seq, B, F) bf16
    lengths = jnp.minimum(lengths, Ww)                                # readout guard

    # ---- fused 2-layer LSTM + many-to-one + dense + log_softmax (one kernel) ----
    # (pack/pad is a no-op for the causal many-to-one readout at lengths-1)
    return crnn_recur_dense(xseq, params, lengths)


# ============================== main ==============================

if __name__ == "__main__":
    key = jax.random.PRNGKey(0)
    k_par, k_x = jax.random.split(key)

    B, L = 2, 512
    x = jax.random.normal(k_x, (B, L, IN_CHAN), dtype=jnp.float32)    # raw audio (B, T, C)
    lengths = jnp.array([512, 320], dtype=jnp.int32)                  # sorted descending

    params = init_params(k_par)
    out = jax.jit(audio_crnn_forward)(params, x, lengths)             # (B, N_CLASSES) log-probs
    out = jax.block_until_ready(out)

    assert out.shape == (B, N_CLASSES)
    assert bool(jnp.all(jnp.isfinite(out)))
    print("KERNEL_OK")
</pallas_src>

<mosaic_0001>
module attributes {stable_mosaic.version = 11 : i64} {
  func.func @spec_mel_kernel(%arg0: i32, %arg1: memref<128x128xbf16, #tpu.memory_space<vmem>>, %arg2: memref<256x128xbf16, #tpu.memory_space<vmem>>, %arg3: memref<32x128xbf16, #tpu.memory_space<vmem>>, %arg4: memref<32x128xf32, #tpu.memory_space<vmem>>) attributes {dimension_semantics = [#tpu.dimension_semantics<parallel>], iteration_bounds = array<i64: 1>, scalar_prefetch = 0 : i64, scratch_operands = 0 : i64, tpu.core_type = #tpu.core_type<tc>, window_params = [{transform_indices = @transform_0, window_bounds = array<i64: 128, 128>}, {pipeline_mode = #tpu.pipeline_mode<synchronous>, transform_indices = @transform_1, window_bounds = array<i64: 256, 128>}, {pipeline_mode = #tpu.pipeline_mode<synchronous>, transform_indices = @transform_2, window_bounds = array<i64: 32, 128>}, {transform_indices = @transform_3, window_bounds = array<i64: 32, 128>}]} {
    %c0 = arith.constant 0 : index
    %c0_0 = arith.constant 0 : index
    %0 = vector.load %arg2[%c0, %c0_0] : memref<256x128xbf16, #tpu.memory_space<vmem>>, vector<256x128xbf16>
    %c0_1 = arith.constant 0 : index
    %c0_2 = arith.constant 0 : index
    %1 = vector.load %arg1[%c0_1, %c0_2] : memref<128x128xbf16, #tpu.memory_space<vmem>>, vector<128x128xbf16>
    %cst = arith.constant dense<0.000000e+00> : vector<256x128xf32>
    %2 = tpu.matmul %0, %1, %cst {dimension_numbers = #tpu.dot_dimension_numbers<[1], [0], [0], [1], [0, 0, 1, 1], [], []>} : vector<256x128xbf16>, vector<128x128xbf16>, vector<256x128xf32> -> vector<256x128xf32>
    %3 = vector.extract_strided_slice %2 {offsets = [0, 0], sizes = [128, 128], strides = [1, 1]} : vector<256x128xf32> to vector<128x128xf32>
    %4 = vector.extract_strided_slice %2 {offsets = [128, 0], sizes = [128, 128], strides = [1, 1]} : vector<256x128xf32> to vector<128x128xf32>
    %5 = arith.mulf %3, %3 : vector<128x128xf32>
    %6 = arith.mulf %4, %4 : vector<128x128xf32>
    %7 = arith.addf %5, %6 : vector<128x128xf32>
    %8 = arith.truncf %7 : vector<128x128xf32> to vector<128x128xbf16>
    %c0_3 = arith.constant 0 : index
    %c0_4 = arith.constant 0 : index
    %9 = vector.load %arg3[%c0_3, %c0_4] : memref<32x128xbf16, #tpu.memory_space<vmem>>, vector<32x128xbf16>
    %cst_5 = arith.constant dense<0.000000e+00> : vector<32x128xf32>
    %10 = tpu.matmul %9, %8, %cst_5 {dimension_numbers = #tpu.dot_dimension_numbers<[1], [0], [0], [1], [0, 0, 1, 1], [], []>} : vector<32x128xbf16>, vector<128x128xbf16>, vector<32x128xf32> -> vector<32x128xf32>
    %c0_6 = arith.constant 0 : index
    %c0_7 = arith.constant 0 : index
    %11 = vector.load %arg4[%c0_6, %c0_7] : memref<32x128xf32, #tpu.memory_space<vmem>>, vector<32x128xf32>
    tpu.vector_store %arg4[%c0_6, %c0_7], %10 {strides = array<i32>} : memref<32x128xf32, #tpu.memory_space<vmem>>, vector<32x128xf32>,
    return
  }
  func.func @transform_0(%arg0: i32) -> (i32, i32) {
    %c0_i32 = arith.constant 0 : i32
    %c0_i32_0 = arith.constant 0 : i32
    return %c0_i32, %arg0 : i32, i32
  }
  func.func @transform_1(%arg0: i32) -> (i32, i32) {
    %c0_i32 = arith.constant 0 : i32
    %c0_i32_0 = arith.constant 0 : i32
    %c0_i32_1 = arith.constant 0 : i32
    return %c0_i32, %c0_i32_0 : i32, i32
  }
  func.func @transform_2(%arg0: i32) -> (i32, i32) {
    %c0_i32 = arith.constant 0 : i32
    %c0_i32_0 = arith.constant 0 : i32
    %c0_i32_1 = arith.constant 0 : i32
    return %c0_i32, %c0_i32_0 : i32, i32
  }
  func.func @transform_3(%arg0: i32) -> (i32, i32) {
    %c0_i32 = arith.constant 0 : i32
    %c0_i32_0 = arith.constant 0 : i32
    return %c0_i32, %arg0 : i32, i32
  }
}

module attributes {stable_mosaic.version = 11 : i64} {
  func.func @whiten_kernel(%arg0: memref<2x288xf32, #tpu.memory_space<vmem>>, %arg1: memref<2x288xf32, #tpu.memory_space<vmem>>) attributes {dimension_semantics = [], scalar_prefetch = 0 : i64, scratch_operands = 0 : i64, tpu.core_type = #tpu.core_type<tc>} {
    %c0 = arith.constant 0 : index
    %c0_0 = arith.constant 0 : index
    %0 = vector.load %arg0[%c0, %c0_0] : memref<2x288xf32, #tpu.memory_space<vmem>>, vector<2x288xf32>
    %cst = arith.constant dense<0.000000e+00> : vector<2xf32>
    %1 = vector.multi_reduction <add>, %0, %cst [1] : vector<2x288xf32> to vector<2xf32>
    %2 = vector.shape_cast %1 : vector<2xf32> to vector<2x1xf32>
    %cst_1 = arith.constant 2.880000e+02 : f32
    %3 = vector.broadcast %cst_1 : f32 to vector<2x1xf32>
    %4 = arith.divf %2, %3 : vector<2x1xf32>
    %5 = vector.broadcast %4 : vector<2x1xf32> to vector<2x288xf32>
    %6 = arith.subf %0, %5 : vector<2x288xf32>
    %7 = arith.mulf %6, %6 : vector<2x288xf32>
    %cst_2 = arith.constant dense<0.000000e+00> : vector<2xf32>
    %8 = vector.multi_reduction <add>, %7, %cst_2 [1] : vector<2x288xf32> to vector<2xf32>
    %9 = vector.shape_cast %8 : vector<2xf32> to vector<2x1xf32>
    %cst_3 = arith.constant 2.870000e+02 : f32
    %10 = vector.broadcast %cst_3 : f32 to vector<2x1xf32>
    %11 = arith.divf %9, %10 : vector<2x1xf32>
    %cst_4 = arith.constant 9.99999996E-13 : f32
    %12 = vector.broadcast %cst_4 : f32 to vector<2x1xf32>
    %13 = arith.addf %11, %12 : vector<2x1xf32>
    %14 = math.rsqrt %13 : vector<2x1xf32>
    %15 = vector.broadcast %14 : vector<2x1xf32> to vector<2x288xf32>
    %16 = arith.mulf %6, %15 : vector<2x288xf32>
    %c0_5 = arith.constant 0 : index
    %c0_6 = arith.constant 0 : index
    %17 = vector.load %arg1[%c0_5, %c0_6] : memref<2x288xf32, #tpu.memory_space<vmem>>, vector<2x288xf32>
    tpu.vector_store %arg1[%c0_5, %c0_6], %16 {strides = array<i32>} : memref<2x288xf32, #tpu.memory_space<vmem>>, vector<2x288xf32>,
    return
  }
}

module attributes {stable_mosaic.version = 11 : i64} {
  func.func @conv_bn_relu_pool_kernel(%arg0: i32, %arg1: memref<16x9xbf16, #tpu.memory_space<vmem>>, %arg2: memref<9x128xbf16, #tpu.memory_space<vmem>>, %arg3: memref<9x128xbf16, #tpu.memory_space<vmem>>, %arg4: memref<9x128xbf16, #tpu.memory_space<vmem>>, %arg5: memref<9x128xbf16, #tpu.memory_space<vmem>>, %arg6: memref<16x1xf32, #tpu.memory_space<vmem>>, %arg7: memref<16x1xf32, #tpu.memory_space<vmem>>, %arg8: memref<16x128xbf16, #tpu.memory_space<vmem>>) attributes {dimension_semantics = [#tpu.dimension_semantics<parallel>], iteration_bounds = array<i64: 1>, scalar_prefetch = 0 : i64, scratch_operands = 0 : i64, tpu.core_type = #tpu.core_type<tc>, window_params = [{pipeline_mode = #tpu.pipeline_mode<synchronous>, transform_indices = @transform_0, window_bounds = array<i64: 16, 9>}, {transform_indices = @transform_1, window_bounds = array<i64: 9, 128>}, {transform_indices = @transform_2, window_bounds = array<i64: 9, 128>}, {transform_indices = @transform_3, window_bounds = array<i64: 9, 128>}, {transform_indices = @transform_4, window_bounds = array<i64: 9, 128>}, {pipeline_mode = #tpu.pipeline_mode<synchronous>, transform_indices = @transform_5, window_bounds = array<i64: 16, 1>}, {pipeline_mode = #tpu.pipeline_mode<synchronous>, transform_indices = @transform_6, window_bounds = array<i64: 16, 1>}, {transform_indices = @transform_7, window_bounds = array<i64: 16, 128>}]} {
    %c0 = arith.constant 0 : index
    %c0_0 = arith.constant 0 : index
    %0 = vector.load %arg1[%c0, %c0_0] : memref<16x9xbf16, #tpu.memory_space<vmem>>, vector<16x9xbf16>
    %c0_1 = arith.constant 0 : index
    %c0_2 = arith.constant 0 : index
    %1 = vector.load %arg6[%c0_1, %c0_2] : memref<16x1xf32, #tpu.memory_space<vmem>>, vector<16x1xf32>
    %c0_3 = arith.constant 0 : index
    %c0_4 = arith.constant 0 : index
    %2 = vector.load %arg7[%c0_3, %c0_4] : memref<16x1xf32, #tpu.memory_space<vmem>>, vector<16x1xf32>
    %c0_5 = arith.constant 0 : index
    %c0_6 = arith.constant 0 : index
    %3 = vector.load %arg2[%c0_5, %c0_6] : memref<9x128xbf16, #tpu.memory_space<vmem>>, vector<9x128xbf16>
    %cst = arith.constant dense<0.000000e+00> : vector<16x128xf32>
    %4 = tpu.matmul %0, %3, %cst {dimension_numbers = #tpu.dot_dimension_numbers<[1], [0], [0], [1], [0, 0, 1, 1], [], []>} : vector<16x9xbf16>, vector<9x128xbf16>, vector<16x128xf32> -> vector<16x128xf32>
    %5 = vector.broadcast %1 : vector<16x1xf32> to vector<16x128xf32>
    %6 = arith.mulf %4, %5 : vector<16x128xf32>
    %7 = vector.broadcast %2 : vector<16x1xf32> to vector<16x128xf32>
    %8 = arith.addf %6, %7 : vector<16x128xf32>
    %cst_7 = arith.constant 0.000000e+00 : f32
    %9 = vector.broadcast %cst_7 : f32 to vector<16x128xf32>
    %10 = arith.maximumf %8, %9 : vector<16x128xf32>
    %c0_8 = arith.constant 0 : index
    %c0_9 = arith.constant 0 : index
    %11 = vector.load %arg3[%c0_8, %c0_9] : memref<9x128xbf16, #tpu.memory_space<vmem>>, vector<9x128xbf16>
    %cst_10 = arith.constant dense<0.000000e+00> : vector<16x128xf32>
    %12 = tpu.matmul %0, %11, %cst_10 {dimension_numbers = #tpu.dot_dimension_numbers<[1], [0], [0], [1], [0, 0, 1, 1], [], []>} : vector<16x9xbf16>, vector<9x128xbf16>, vector<16x128xf32> -> vector<16x128xf32>
    %13 = vector.broadcast %1 : vector<16x1xf32> to vector<16x128xf32>
    %14 = arith.mulf %12, %13 : vector<16x128xf32>
    %15 = vector.broadcast %2 : vector<16x1xf32> to vector<16x128xf32>
    %16 = arith.addf %14, %15 : vector<16x128xf32>
    %cst_11 = arith.constant 0.000000e+00 : f32
    %17 = vector.broadcast %cst_11 : f32 to vector<16x128xf32>
    %18 = arith.maximumf %16, %17 : vector<16x128xf32>
    %19 = arith.maximumf %10, %18 : vector<16x128xf32>
    %c0_12 = arith.constant 0 : index
    %c0_13 = arith.constant 0 : index
    %20 = vector.load %arg4[%c0_12, %c0_13] : memref<9x128xbf16, #tpu.memory_space<vmem>>, vector<9x128xbf16>
    %cst_14 = arith.constant dense<0.000000e+00> : vector<16x128xf32>
    %21 = tpu.matmul %0, %20, %cst_14 {dimension_numbers = #tpu.dot_dimension_numbers<[1], [0], [0], [1], [0, 0, 1, 1], [], []>} : vector<16x9xbf16>, vector<9x128xbf16>, vector<16x128xf32> -> vector<16x128xf32>
    %22 = vector.broadcast %1 : vector<16x1xf32> to vector<16x128xf32>
    %23 = arith.mulf %21, %22 : vector<16x128xf32>
    %24 = vector.broadcast %2 : vector<16x1xf32> to vector<16x128xf32>
    %25 = arith.addf %23, %24 : vector<16x128xf32>
    %cst_15 = arith.constant 0.000000e+00 : f32
    %26 = vector.broadcast %cst_15 : f32 to vector<16x128xf32>
    %27 = arith.maximumf %25, %26 : vector<16x128xf32>
    %28 = arith.maximumf %19, %27 : vector<16x128xf32>
    %c0_16 = arith.constant 0 : index
    %c0_17 = arith.constant 0 : index
    %29 = vector.load %arg5[%c0_16, %c0_17] : memref<9x128xbf16, #tpu.memory_space<vmem>>, vector<9x128xbf16>
    %cst_18 = arith.constant dense<0.000000e+00> : vector<16x128xf32>
    %30 = tpu.matmul %0, %29, %cst_18 {dimension_numbers = #tpu.dot_dimension_numbers<[1], [0], [0], [1], [0, 0, 1, 1], [], []>} : vector<16x9xbf16>, vector<9x128xbf16>, vector<16x128xf32> -> vector<16x128xf32>
    %31 = vector.broadcast %1 : vector<16x1xf32> to vector<16x128xf32>
    %32 = arith.mulf %30, %31 : vector<16x128xf32>
    %33 = vector.broadcast %2 : vector<16x1xf32> to vector<16x128xf32>
    %34 = arith.addf %32, %33 : vector<16x128xf32>
    %cst_19 = arith.constant 0.000000e+00 : f32
    %35 = vector.broadcast %cst_19 : f32 to vector<16x128xf32>
    %36 = arith.maximumf %34, %35 : vector<16x128xf32>
    %37 = arith.maximumf %28, %36 : vector<16x128xf32>
    %38 = arith.truncf %37 : vector<16x128xf32> to vector<16x128xbf16>
    %c0_20 = arith.constant 0 : index
    %c0_21 = arith.constant 0 : index
    %39 = vector.load %arg8[%c0_20, %c0_21] : memref<16x128xbf16, #tpu.memory_space<vmem>>, vector<16x128xbf16>
    tpu.vector_store %arg8[%c0_20, %c0_21], %38 {strides = array<i32>} : memref<16x128xbf16, #tpu.memory_space<vmem>>, vector<16x128xbf16>,
    return
  }
  func.func @transform_0(%arg0: i32) -> (i32, i32) {
    %c0_i32 = arith.constant 0 : i32
    %c0_i32_0 = arith.constant 0 : i32
    %c0_i32_1 = arith.constant 0 : i32
    return %c0_i32, %c0_i32_0 : i32, i32
  }
  func.func @transform_1(%arg0: i32) -> (i32, i32) {
    %c0_i32 = arith.constant 0 : i32
    %c0_i32_0 = arith.constant 0 : i32
    return %c0_i32, %arg0 : i32, i32
  }
  func.func @transform_2(%arg0: i32) -> (i32, i32) {
    %c0_i32 = arith.constant 0 : i32
    %c0_i32_0 = arith.constant 0 : i32
    return %c0_i32, %arg0 : i32, i32
  }
  func.func @transform_3(%arg0: i32) -> (i32, i32) {
    %c0_i32 = arith.constant 0 : i32
    %c0_i32_0 = arith.constant 0 : i32
    return %c0_i32, %arg0 : i32, i32
  }
  func.func @transform_4(%arg0: i32) -> (i32, i32) {
    %c0_i32 = arith.constant 0 : i32
    %c0_i32_0 = arith.constant 0 : i32
    return %c0_i32, %arg0 : i32, i32
  }
  func.func @transform_5(%arg0: i32) -> (i32, i32) {
    %c0_i32 = arith.constant 0 : i32
    %c0_i32_0 = arith.constant 0 : i32
    %c0_i32_1 = arith.constant 0 : i32
    return %c0_i32, %c0_i32_0 : i32, i32
  }
  func.func @transform_6(%arg0: i32) -> (i32, i32) {
    %c0_i32 = arith.constant 0 : i32
    %c0_i32_0 = arith.constant 0 : i32
    %c0_i32_1 = arith.constant 0 : i32
    return %c0_i32, %c0_i32_0 : i32, i32
  }
  func.func @transform_7(%arg0: i32) -> (i32, i32) {
    %c0_i32 = arith.constant 0 : i32
    %c0_i32_0 = arith.constant 0 : i32
    return %c0_i32, %arg0 : i32, i32
  }
}

module attributes {stable_mosaic.version = 11 : i64} {
  func.func @conv_bn_relu_pool_kernel(%arg0: i32, %arg1: memref<32x144xbf16, #tpu.memory_space<vmem>>, %arg2: memref<144x128xbf16, #tpu.memory_space<vmem>>, %arg3: memref<144x128xbf16, #tpu.memory_space<vmem>>, %arg4: memref<144x128xbf16, #tpu.memory_space<vmem>>, %arg5: memref<144x128xbf16, #tpu.memory_space<vmem>>, %arg6: memref<32x1xf32, #tpu.memory_space<vmem>>, %arg7: memref<32x1xf32, #tpu.memory_space<vmem>>, %arg8: memref<32x128xbf16, #tpu.memory_space<vmem>>) attributes {dimension_semantics = [#tpu.dimension_semantics<parallel>], iteration_bounds = array<i64: 1>, scalar_prefetch = 0 : i64, scratch_operands = 0 : i64, tpu.core_type = #tpu.core_type<tc>, window_params = [{pipeline_mode = #tpu.pipeline_mode<synchronous>, transform_indices = @transform_0, window_bounds = array<i64: 32, 144>}, {transform_indices = @transform_1, window_bounds = array<i64: 144, 128>}, {transform_indices = @transform_2, window_bounds = array<i64: 144, 128>}, {transform_indices = @transform_3, window_bounds = array<i64: 144, 128>}, {transform_indices = @transform_4, window_bounds = array<i64: 144, 128>}, {pipeline_mode = #tpu.pipeline_mode<synchronous>, transform_indices = @transform_5, window_bounds = array<i64: 32, 1>}, {pipeline_mode = #tpu.pipeline_mode<synchronous>, transform_indices = @transform_6, window_bounds = array<i64: 32, 1>}, {transform_indices = @transform_7, window_bounds = array<i64: 32, 128>}]} {
    %c0 = arith.constant 0 : index
    %c0_0 = arith.constant 0 : index
    %0 = vector.load %arg1[%c0, %c0_0] : memref<32x144xbf16, #tpu.memory_space<vmem>>, vector<32x144xbf16>
    %c0_1 = arith.constant 0 : index
    %c0_2 = arith.constant 0 : index
    %1 = vector.load %arg6[%c0_1, %c0_2] : memref<32x1xf32, #tpu.memory_space<vmem>>, vector<32x1xf32>
    %c0_3 = arith.constant 0 : index
    %c0_4 = arith.constant 0 : index
    %2 = vector.load %arg7[%c0_3, %c0_4] : memref<32x1xf32, #tpu.memory_space<vmem>>, vector<32x1xf32>
    %c0_5 = arith.constant 0 : index
    %c0_6 = arith.constant 0 : index
    %3 = vector.load %arg2[%c0_5, %c0_6] : memref<144x128xbf16, #tpu.memory_space<vmem>>, vector<144x128xbf16>
    %cst = arith.constant dense<0.000000e+00> : vector<32x128xf32>
    %4 = tpu.matmul %0, %3, %cst {dimension_numbers = #tpu.dot_dimension_numbers<[1], [0], [0], [1], [0, 0, 1, 1], [], []>} : vector<32x144xbf16>, vector<144x128xbf16>, vector<32x128xf32> -> vector<32x128xf32>
    %5 = vector.broadcast %1 : vector<32x1xf32> to vector<32x128xf32>
    %6 = arith.mulf %4, %5 : vector<32x128xf32>
    %7 = vector.broadcast %2 : vector<32x1xf32> to vector<32x128xf32>
    %8 = arith.addf %6, %7 : vector<32x128xf32>
    %cst_7 = arith.constant 0.000000e+00 : f32
    %9 = vector.broadcast %cst_7 : f32 to vector<32x128xf32>
    %10 = arith.maximumf %8, %9 : vector<32x128xf32>
    %c0_8 = arith.constant 0 : index
    %c0_9 = arith.constant 0 : index
    %11 = vector.load %arg3[%c0_8, %c0_9] : memref<144x128xbf16, #tpu.memory_space<vmem>>, vector<144x128xbf16>
    %cst_10 = arith.constant dense<0.000000e+00> : vector<32x128xf32>
    %12 = tpu.matmul %0, %11, %cst_10 {dimension_numbers = #tpu.dot_dimension_numbers<[1], [0], [0], [1], [0, 0, 1, 1], [], []>} : vector<32x144xbf16>, vector<144x128xbf16>, vector<32x128xf32> -> vector<32x128xf32>
    %13 = vector.broadcast %1 : vector<32x1xf32> to vector<32x128xf32>
    %14 = arith.mulf %12, %13 : vector<32x128xf32>
    %15 = vector.broadcast %2 : vector<32x1xf32> to vector<32x128xf32>
    %16 = arith.addf %14, %15 : vector<32x128xf32>
    %cst_11 = arith.constant 0.000000e+00 : f32
    %17 = vector.broadcast %cst_11 : f32 to vector<32x128xf32>
    %18 = arith.maximumf %16, %17 : vector<32x128xf32>
    %19 = arith.maximumf %10, %18 : vector<32x128xf32>
    %c0_12 = arith.constant 0 : index
    %c0_13 = arith.constant 0 : index
    %20 = vector.load %arg4[%c0_12, %c0_13] : memref<144x128xbf16, #tpu.memory_space<vmem>>, vector<144x128xbf16>
    %cst_14 = arith.constant dense<0.000000e+00> : vector<32x128xf32>
    %21 = tpu.matmul %0, %20, %cst_14 {dimension_numbers = #tpu.dot_dimension_numbers<[1], [0], [0], [1], [0, 0, 1, 1], [], []>} : vector<32x144xbf16>, vector<144x128xbf16>, vector<32x128xf32> -> vector<32x128xf32>
    %22 = vector.broadcast %1 : vector<32x1xf32> to vector<32x128xf32>
    %23 = arith.mulf %21, %22 : vector<32x128xf32>
    %24 = vector.broadcast %2 : vector<32x1xf32> to vector<32x128xf32>
    %25 = arith.addf %23, %24 : vector<32x128xf32>
    %cst_15 = arith.constant 0.000000e+00 : f32
    %26 = vector.broadcast %cst_15 : f32 to vector<32x128xf32>
    %27 = arith.maximumf %25, %26 : vector<32x128xf32>
    %28 = arith.maximumf %19, %27 : vector<32x128xf32>
    %c0_16 = arith.constant 0 : index
    %c0_17 = arith.constant 0 : index
    %29 = vector.load %arg5[%c0_16, %c0_17] : memref<144x128xbf16, #tpu.memory_space<vmem>>, vector<144x128xbf16>
    %cst_18 = arith.constant dense<0.000000e+00> : vector<32x128xf32>
    %30 = tpu.matmul %0, %29, %cst_18 {dimension_numbers = #tpu.dot_dimension_numbers<[1], [0], [0], [1], [0, 0, 1, 1], [], []>} : vector<32x144xbf16>, vector<144x128xbf16>, vector<32x128xf32> -> vector<32x128xf32>
    %31 = vector.broadcast %1 : vector<32x1xf32> to vector<32x128xf32>
    %32 = arith.mulf %30, %31 : vector<32x128xf32>
    %33 = vector.broadcast %2 : vector<32x1xf32> to vector<32x128xf32>
    %34 = arith.addf %32, %33 : vector<32x128xf32>
    %cst_19 = arith.constant 0.000000e+00 : f32
    %35 = vector.broadcast %cst_19 : f32 to vector<32x128xf32>
    %36 = arith.maximumf %34, %35 : vector<32x128xf32>
    %37 = arith.maximumf %28, %36 : vector<32x128xf32>
    %38 = arith.truncf %37 : vector<32x128xf32> to vector<32x128xbf16>
    %c0_20 = arith.constant 0 : index
    %c0_21 = arith.constant 0 : index
    %39 = vector.load %arg8[%c0_20, %c0_21] : memref<32x128xbf16, #tpu.memory_space<vmem>>, vector<32x128xbf16>
    tpu.vector_store %arg8[%c0_20, %c0_21], %38 {strides = array<i32>} : memref<32x128xbf16, #tpu.memory_space<vmem>>, vector<32x128xbf16>,
    return
  }
  func.func @transform_0(%arg0: i32) -> (i32, i32) {
    %c0_i32 = arith.constant 0 : i32
    %c0_i32_0 = arith.constant 0 : i32
    %c0_i32_1 = arith.constant 0 : i32
    return %c0_i32, %c0_i32_0 : i32, i32
  }
  func.func @transform_1(%arg0: i32) -> (i32, i32) {
    %c0_i32 = arith.constant 0 : i32
    %c0_i32_0 = arith.constant 0 : i32
    return %c0_i32, %arg0 : i32, i32
  }
  func.func @transform_2(%arg0: i32) -> (i32, i32) {
    %c0_i32 = arith.constant 0 : i32
    %c0_i32_0 = arith.constant 0 : i32
    return %c0_i32, %arg0 : i32, i32
  }
  func.func @transform_3(%arg0: i32) -> (i32, i32) {
    %c0_i32 = arith.constant 0 : i32
    %c0_i32_0 = arith.constant 0 : i32
    return %c0_i32, %arg0 : i32, i32
  }
  func.func @transform_4(%arg0: i32) -> (i32, i32) {
    %c0_i32 = arith.constant 0 : i32
    %c0_i32_0 = arith.constant 0 : i32
    return %c0_i32, %arg0 : i32, i32
  }
  func.func @transform_5(%arg0: i32) -> (i32, i32) {
    %c0_i32 = arith.constant 0 : i32
    %c0_i32_0 = arith.constant 0 : i32
    %c0_i32_1 = arith.constant 0 : i32
    return %c0_i32, %c0_i32_0 : i32, i32
  }
  func.func @transform_6(%arg0: i32) -> (i32, i32) {
    %c0_i32 = arith.constant 0 : i32
    %c0_i32_0 = arith.constant 0 : i32
    %c0_i32_1 = arith.constant 0 : i32
    return %c0_i32, %c0_i32_0 : i32, i32
  }
  func.func @transform_7(%arg0: i32) -> (i32, i32) {
    %c0_i32 = arith.constant 0 : i32
    %c0_i32_0 = arith.constant 0 : i32
    return %c0_i32, %arg0 : i32, i32
  }
}

module attributes {stable_mosaic.version = 11 : i64} {
  func.func @crnn_recur_dense_kernel(%arg0: i32, %arg1: memref<2x8x256xbf16, #tpu.memory_space<vmem>>, %arg2: memref<256x256xbf16, #tpu.memory_space<vmem>>, %arg3: memref<64x256xbf16, #tpu.memory_space<vmem>>, %arg4: memref<1x256xf32, #tpu.memory_space<vmem>>, %arg5: memref<128x256xbf16, #tpu.memory_space<vmem>>, %arg6: memref<1x256xf32, #tpu.memory_space<vmem>>, %arg7: memref<8x1xi32, #tpu.memory_space<vmem>>, %arg8: memref<64x10xbf16, #tpu.memory_space<vmem>>, %arg9: memref<1x10xf32, #tpu.memory_space<vmem>>, %arg10: memref<8x10xf32, #tpu.memory_space<vmem>>, %arg11: memref<2x8x256xf32, #tpu.memory_space<vmem>>) attributes {dimension_semantics = [#tpu.dimension_semantics<parallel>], iteration_bounds = array<i64: 1>, scalar_prefetch = 0 : i64, scratch_operands = 1 : i64, tpu.core_type = #tpu.core_type<tc>, window_params = [{transform_indices = @transform_0, window_bounds = array<i64: 2, 8, 256>}, {pipeline_mode = #tpu.pipeline_mode<synchronous>, transform_indices = @transform_1, window_bounds = array<i64: 256, 256>}, {pipeline_mode = #tpu.pipeline_mode<synchronous>, transform_indices = @transform_2, window_bounds = array<i64: 64, 256>}, {pipeline_mode = #tpu.pipeline_mode<synchronous>, transform_indices = @transform_3, window_bounds = array<i64: 1, 256>}, {pipeline_mode = #tpu.pipeline_mode<synchronous>, transform_indices = @transform_4, window_bounds = array<i64: 128, 256>}, {pipeline_mode = #tpu.pipeline_mode<synchronous>, transform_indices = @transform_5, window_bounds = array<i64: 1, 256>}, {transform_indices = @transform_6, window_bounds = array<i64: 8, 1>}, {pipeline_mode = #tpu.pipeline_mode<synchronous>, transform_indices = @transform_7, window_bounds = array<i64: 64, 10>}, {pipeline_mode = #tpu.pipeline_mode<synchronous>, transform_indices = @transform_8, window_bounds = array<i64: 1, 10>}, {transform_indices = @transform_9, window_bounds = array<i64: 8, 10>}]} {
    %c0 = arith.constant 0 : index
    %c0_0 = arith.constant 0 : index
    %c0_1 = arith.constant 0 : index
    %0 = vector.load %arg1[%c0, %c0_0, %c0_1] : memref<2x8x256xbf16, #tpu.memory_space<vmem>>, vector<2x8x256xbf16>
    %1 = vector.shape_cast %0 : vector<2x8x256xbf16> to vector<16x256xbf16>
    %c0_2 = arith.constant 0 : index
    %c0_3 = arith.constant 0 : index
    %2 = vector.load %arg2[%c0_2, %c0_3] : memref<256x256xbf16, #tpu.memory_space<vmem>>, vector<256x256xbf16>
    %cst = arith.constant dense<0.000000e+00> : vector<16x256xf32>
    %3 = tpu.matmul %1, %2, %cst {dimension_numbers = #tpu.dot_dimension_numbers<[1], [0], [0], [1], [0, 0, 1, 1], [], []>} : vector<16x256xbf16>, vector<256x256xbf16>, vector<16x256xf32> -> vector<16x256xf32>
    %c0_4 = arith.constant 0 : index
    %c0_5 = arith.constant 0 : index
    %4 = vector.load %arg4[%c0_4, %c0_5] : memref<1x256xf32, #tpu.memory_space<vmem>>, vector<1x256xf32>
    %5 = vector.broadcast %4 : vector<1x256xf32> to vector<16x256xf32>
    %6 = arith.addf %3, %5 : vector<16x256xf32>
    %7 = vector.shape_cast %6 : vector<16x256xf32> to vector<2x8x256xf32>
    %c0_6 = arith.constant 0 : index
    %c0_7 = arith.constant 0 : index
    %c0_8 = arith.constant 0 : index
    %8 = vector.load %arg11[%c0_6, %c0_7, %c0_8] : memref<2x8x256xf32, #tpu.memory_space<vmem>>, vector<2x8x256xf32>
    tpu.vector_store %arg11[%c0_6, %c0_7, %c0_8], %7 {strides = array<i32>} : memref<2x8x256xf32, #tpu.memory_space<vmem>>, vector<2x8x256xf32>,
    %c0_9 = arith.constant 0 : index
    %c0_10 = arith.constant 0 : index
    %9 = vector.load %arg7[%c0_9, %c0_10] : memref<8x1xi32, #tpu.memory_space<vmem>>, vector<8x1xi32>
    %c0_11 = arith.constant 0 : index
    %c0_12 = arith.constant 0 : index
    %10 = vector.load %arg6[%c0_11, %c0_12] : memref<1x256xf32, #tpu.memory_space<vmem>>, vector<1x256xf32>
    %11 = vector.shape_cast %10 : vector<1x256xf32> to vector<1x256xf32>
    %12 = vector.broadcast %11 : vector<1x256xf32> to vector<8x256xf32>
    %cst_13 = arith.constant 0.000000e+00 : f32
    %13 = vector.broadcast %cst_13 : f32 to vector<8x64xf32>
    %c0_i32 = arith.constant 0 : i32
    %14 = arith.index_cast %c0_i32 : i32 to index
    %c0_14 = arith.constant 0 : index
    %c0_15 = arith.constant 0 : index
    %15 = vector.load %arg11[%14, %c0_14, %c0_15] : memref<2x8x256xf32, #tpu.memory_space<vmem>>, vector<1x8x256xf32>
    %16 = vector.shape_cast %15 : vector<1x8x256xf32> to vector<8x256xf32>
    %17 = arith.truncf %13 : vector<8x64xf32> to vector<8x64xbf16>
    %c0_16 = arith.constant 0 : index
    %c0_17 = arith.constant 0 : index
    %18 = vector.load %arg3[%c0_16, %c0_17] : memref<64x256xbf16, #tpu.memory_space<vmem>>, vector<64x256xbf16>
    %cst_18 = arith.constant dense<0.000000e+00> : vector<8x256xf32>
    %19 = tpu.matmul %17, %18, %cst_18 {dimension_numbers = #tpu.dot_dimension_numbers<[1], [0], [0], [1], [0, 0, 1, 1], [], []>} : vector<8x64xbf16>, vector<64x256xbf16>, vector<8x256xf32> -> vector<8x256xf32>
    %20 = arith.addf %16, %19 : vector<8x256xf32>
    %21 = vector.extract_strided_slice %20 {offsets = [0, 0], sizes = [8, 192], strides = [1, 1]} : vector<8x256xf32> to vector<8x192xf32>
    %22 = arith.negf %21 : vector<8x192xf32>
    %23 = math.exp %22 : vector<8x192xf32>
    %cst_19 = arith.constant 1.000000e+00 : f32
    %24 = vector.broadcast %cst_19 : f32 to vector<8x192xf32>
    %25 = arith.addf %24, %23 : vector<8x192xf32>
    %26 = arith.divf %24, %25 : vector<8x192xf32>
    %27 = vector.extract_strided_slice %26 {offsets = [0, 0], sizes = [8, 64], strides = [1, 1]} : vector<8x192xf32> to vector<8x64xf32>
    %28 = vector.extract_strided_slice %26 {offsets = [0, 64], sizes = [8, 64], strides = [1, 1]} : vector<8x192xf32> to vector<8x64xf32>
    %29 = vector.extract_strided_slice %26 {offsets = [0, 128], sizes = [8, 64], strides = [1, 1]} : vector<8x192xf32> to vector<8x64xf32>
    %30 = vector.extract_strided_slice %20 {offsets = [0, 192], sizes = [8, 64], strides = [1, 1]} : vector<8x256xf32> to vector<8x64xf32>
    %31 = math.tanh %30 : vector<8x64xf32>
    %32 = arith.mulf %28, %13 : vector<8x64xf32>
    %33 = arith.mulf %27, %31 : vector<8x64xf32>
    %34 = arith.addf %32, %33 : vector<8x64xf32>
    %35 = math.tanh %34 : vector<8x64xf32>
    %36 = arith.mulf %29, %35 : vector<8x64xf32>
    %37 = tpu.concatenate %36, %13 in 1 : vector<8x64xf32>, vector<8x64xf32> -> vector<8x128xf32>
    %38 = arith.truncf %37 : vector<8x128xf32> to vector<8x128xbf16>
    %c0_20 = arith.constant 0 : index
    %c0_21 = arith.constant 0 : index
    %39 = vector.load %arg5[%c0_20, %c0_21] : memref<128x256xbf16, #tpu.memory_space<vmem>>, vector<128x256xbf16>
    %cst_22 = arith.constant dense<0.000000e+00> : vector<8x256xf32>
    %40 = tpu.matmul %38, %39, %cst_22 {dimension_numbers = #tpu.dot_dimension_numbers<[1], [0], [0], [1], [0, 0, 1, 1], [], []>} : vector<8x128xbf16>, vector<128x256xbf16>, vector<8x256xf32> -> vector<8x256xf32>
    %41 = arith.addf %40, %12 : vector<8x256xf32>
    %42 = vector.extract_strided_slice %41 {offsets = [0, 0], sizes = [8, 192], strides = [1, 1]} : vector<8x256xf32> to vector<8x192xf32>
    %43 = arith.negf %42 : vector<8x192xf32>
    %44 = math.exp %43 : vector<8x192xf32>
    %cst_23 = arith.constant 1.000000e+00 : f32
    %45 = vector.broadcast %cst_23 : f32 to vector<8x192xf32>
    %46 = arith.addf %45, %44 : vector<8x192xf32>
    %47 = arith.divf %45, %46 : vector<8x192xf32>
    %48 = vector.extract_strided_slice %47 {offsets = [0, 0], sizes = [8, 64], strides = [1, 1]} : vector<8x192xf32> to vector<8x64xf32>
    %49 = vector.extract_strided_slice %47 {offsets = [0, 64], sizes = [8, 64], strides = [1, 1]} : vector<8x192xf32> to vector<8x64xf32>
    %50 = vector.extract_strided_slice %47 {offsets = [0, 128], sizes = [8, 64], strides = [1, 1]} : vector<8x192xf32> to vector<8x64xf32>
    %51 = vector.extract_strided_slice %41 {offsets = [0, 192], sizes = [8, 64], strides = [1, 1]} : vector<8x256xf32> to vector<8x64xf32>
    %52 = math.tanh %51 : vector<8x64xf32>
    %53 = arith.mulf %49, %13 : vector<8x64xf32>
    %54 = arith.mulf %48, %52 : vector<8x64xf32>
    %55 = arith.addf %53, %54 : vector<8x64xf32>
    %56 = math.tanh %55 : vector<8x64xf32>
    %57 = arith.mulf %50, %56 : vector<8x64xf32>
    %c1_i32 = arith.constant 1 : i32
    %58 = arith.addi %c0_i32, %c1_i32 : i32
    %59 = vector.broadcast %58 : i32 to vector<8x1xi32>
    %60 = arith.cmpi eq, %9, %59 : vector<8x1xi32>
    %61 = vector.shape_cast %60 : vector<8x1xi1> to vector<8x1xi1>
    %62 = vector.broadcast %61 : vector<8x1xi1> to vector<8x64xi1>
    %63 = arith.select %62, %57, %13 : vector<8x64xi1>, vector<8x64xf32>
    %c1_i32_24 = arith.constant 1 : i32
    %64 = arith.index_cast %c1_i32_24 : i32 to index
    %c0_25 = arith.constant 0 : index
    %c0_26 = arith.constant 0 : index
    %65 = vector.load %arg11[%64, %c0_25, %c0_26] : memref<2x8x256xf32, #tpu.memory_space<vmem>>, vector<1x8x256xf32>
    %66 = vector.shape_cast %65 : vector<1x8x256xf32> to vector<8x256xf32>
    %67 = arith.truncf %36 : vector<8x64xf32> to vector<8x64xbf16>
    %c0_27 = arith.constant 0 : index
    %c0_28 = arith.constant 0 : index
    %68 = vector.load %arg3[%c0_27, %c0_28] : memref<64x256xbf16, #tpu.memory_space<vmem>>, vector<64x256xbf16>
    %cst_29 = arith.constant dense<0.000000e+00> : vector<8x256xf32>
    %69 = tpu.matmul %67, %68, %cst_29 {dimension_numbers = #tpu.dot_dimension_numbers<[1], [0], [0], [1], [0, 0, 1, 1], [], []>} : vector<8x64xbf16>, vector<64x256xbf16>, vector<8x256xf32> -> vector<8x256xf32>
    %70 = arith.addf %66, %69 : vector<8x256xf32>
    %71 = vector.extract_strided_slice %70 {offsets = [0, 0], sizes = [8, 192], strides = [1, 1]} : vector<8x256xf32> to vector<8x192xf32>
    %72 = arith.negf %71 : vector<8x192xf32>
    %73 = math.exp %72 : vector<8x192xf32>
    %cst_30 = arith.constant 1.000000e+00 : f32
    %74 = vector.broadcast %cst_30 : f32 to vector<8x192xf32>
    %75 = arith.addf %74, %73 : vector<8x192xf32>
    %76 = arith.divf %74, %75 : vector<8x192xf32>
    %77 = vector.extract_strided_slice %76 {offsets = [0, 0], sizes = [8, 64], strides = [1, 1]} : vector<8x192xf32> to vector<8x64xf32>
    %78 = vector.extract_strided_slice %76 {offsets = [0, 64], sizes = [8, 64], strides = [1, 1]} : vector<8x192xf32> to vector<8x64xf32>
    %79 = vector.extract_strided_slice %76 {offsets = [0, 128], sizes = [8, 64], strides = [1, 1]} : vector<8x192xf32> to vector<8x64xf32>
    %80 = vector.extract_strided_slice %70 {offsets = [0, 192], sizes = [8, 64], strides = [1, 1]} : vector<8x256xf32> to vector<8x64xf32>
    %81 = math.tanh %80 : vector<8x64xf32>
    %82 = arith.mulf %78, %34 : vector<8x64xf32>
    %83 = arith.mulf %77, %81 : vector<8x64xf32>
    %84 = arith.addf %82, %83 : vector<8x64xf32>
    %85 = math.tanh %84 : vector<8x64xf32>
    %86 = arith.mulf %79, %85 : vector<8x64xf32>
    %87 = tpu.concatenate %86, %57 in 1 : vector<8x64xf32>, vector<8x64xf32> -> vector<8x128xf32>
    %88 = arith.truncf %87 : vector<8x128xf32> to vector<8x128xbf16>
    %c0_31 = arith.constant 0 : index
    %c0_32 = arith.constant 0 : index
    %89 = vector.load %arg5[%c0_31, %c0_32] : memref<128x256xbf16, #tpu.memory_space<vmem>>, vector<128x256xbf16>
    %cst_33 = arith.constant dense<0.000000e+00> : vector<8x256xf32>
    %90 = tpu.matmul %88, %89, %cst_33 {dimension_numbers = #tpu.dot_dimension_numbers<[1], [0], [0], [1], [0, 0, 1, 1], [], []>} : vector<8x128xbf16>, vector<128x256xbf16>, vector<8x256xf32> -> vector<8x256xf32>
    %91 = arith.addf %90, %12 : vector<8x256xf32>
    %92 = vector.extract_strided_slice %91 {offsets = [0, 0], sizes = [8, 192], strides = [1, 1]} : vector<8x256xf32> to vector<8x192xf32>
    %93 = arith.negf %92 : vector<8x192xf32>
    %94 = math.exp %93 : vector<8x192xf32>
    %cst_34 = arith.constant 1.000000e+00 : f32
    %95 = vector.broadcast %cst_34 : f32 to vector<8x192xf32>
    %96 = arith.addf %95, %94 : vector<8x192xf32>
    %97 = arith.divf %95, %96 : vector<8x192xf32>
    %98 = vector.extract_strided_slice %97 {offsets = [0, 0], sizes = [8, 64], strides = [1, 1]} : vector<8x192xf32> to vector<8x64xf32>
    %99 = vector.extract_strided_slice %97 {offsets = [0, 64], sizes = [8, 64], strides = [1, 1]} : vector<8x192xf32> to vector<8x64xf32>
    %100 = vector.extract_strided_slice %97 {offsets = [0, 128], sizes = [8, 64], strides = [1, 1]} : vector<8x192xf32> to vector<8x64xf32>
    %101 = vector.extract_strided_slice %91 {offsets = [0, 192], sizes = [8, 64], strides = [1, 1]} : vector<8x256xf32> to vector<8x64xf32>
    %102 = math.tanh %101 : vector<8x64xf32>
    %103 = arith.mulf %99, %55 : vector<8x64xf32>
    %104 = arith.mulf %98, %102 : vector<8x64xf32>
    %105 = arith.addf %103, %104 : vector<8x64xf32>
    %106 = math.tanh %105 : vector<8x64xf32>
    %107 = arith.mulf %100, %106 : vector<8x64xf32>
    %c1_i32_35 = arith.constant 1 : i32
    %108 = arith.addi %c1_i32_24, %c1_i32_35 : i32
    %109 = vector.broadcast %108 : i32 to vector<8x1xi32>
    %110 = arith.cmpi eq, %9, %109 : vector<8x1xi32>
    %111 = vector.shape_cast %110 : vector<8x1xi1> to vector<8x1xi1>
    %112 = vector.broadcast %111 : vector<8x1xi1> to vector<8x64xi1>
    %113 = arith.select %112, %107, %63 : vector<8x64xi1>, vector<8x64xf32>
    %c2_i32 = arith.constant 2 : i32
    %114 = arith.truncf %113 : vector<8x64xf32> to vector<8x64xbf16>
    %c0_36 = arith.constant 0 : index
    %c0_37 = arith.constant 0 : index
    %115 = vector.load %arg8[%c0_36, %c0_37] : memref<64x10xbf16, #tpu.memory_space<vmem>>, vector<64x10xbf16>
    %cst_38 = arith.constant dense<0.000000e+00> : vector<8x10xf32>
    %116 = tpu.matmul %114, %115, %cst_38 {dimension_numbers = #tpu.dot_dimension_numbers<[1], [0], [0], [1], [0, 0, 1, 1], [], []>} : vector<8x64xbf16>, vector<64x10xbf16>, vector<8x10xf32> -> vector<8x10xf32>
    %c0_39 = arith.constant 0 : index
    %c0_40 = arith.constant 0 : index
    %117 = vector.load %arg9[%c0_39, %c0_40] : memref<1x10xf32, #tpu.memory_space<vmem>>, vector<1x10xf32>
    %118 = vector.broadcast %117 : vector<1x10xf32> to vector<8x10xf32>
    %119 = arith.addf %116, %118 : vector<8x10xf32>
    %cst_41 = arith.constant dense<0xFF800000> : vector<8xf32>
    %120 = vector.multi_reduction <maximumf>, %119, %cst_41 [1] : vector<8x10xf32> to vector<8xf32>
    %121 = vector.shape_cast %120 : vector<8xf32> to vector<8x1xf32>
    %122 = vector.broadcast %121 : vector<8x1xf32> to vector<8x10xf32>
    %123 = arith.subf %119, %122 : vector<8x10xf32>
    %124 = math.exp %123 : vector<8x10xf32>
    %cst_42 = arith.constant dense<0.000000e+00> : vector<8xf32>
    %125 = vector.multi_reduction <add>, %124, %cst_42 [1] : vector<8x10xf32> to vector<8xf32>
    %126 = vector.shape_cast %125 : vector<8xf32> to vector<8x1xf32>
    %127 = math.log %126 : vector<8x1xf32>
    %128 = vector.broadcast %127 : vector<8x1xf32> to vector<8x10xf32>
    %129 = arith.subf %123, %128 : vector<8x10xf32>
    %c0_43 = arith.constant 0 : index
    %c0_44 = arith.constant 0 : index
    %130 = vector.load %arg10[%c0_43, %c0_44] : memref<8x10xf32, #tpu.memory_space<vmem>>, vector<8x10xf32>
    tpu.vector_store %arg10[%c0_43, %c0_44], %129 {strides = array<i32>} : memref<8x10xf32, #tpu.memory_space<vmem>>, vector<8x10xf32>,
    return
  }
  func.func @transform_0(%arg0: i32) -> (i32, i32, i32) {
    %c0_i32 = arith.constant 0 : i32
    %c0_i32_0 = arith.constant 0 : i32
    %c0_i32_1 = arith.constant 0 : i32
    return %c0_i32, %arg0, %c0_i32_0 : i32, i32, i32
  }
  func.func @transform_1(%arg0: i32) -> (i32, i32) {
    %c0_i32 = arith.constant 0 : i32
    %c0_i32_0 = arith.constant 0 : i32
    %c0_i32_1 = arith.constant 0 : i32
    return %c0_i32, %c0_i32_0 : i32, i32
  }
  func.func @transform_2(%arg0: i32) -> (i32, i32) {
    %c0_i32 = arith.constant 0 : i32
    %c0_i32_0 = arith.constant 0 : i32
    %c0_i32_1 = arith.constant 0 : i32
    return %c0_i32, %c0_i32_0 : i32, i32
  }
  func.func @transform_3(%arg0: i32) -> (i32, i32) {
    %c0_i32 = arith.constant 0 : i32
    %c0_i32_0 = arith.constant 0 : i32
    %c0_i32_1 = arith.constant 0 : i32
    return %c0_i32, %c0_i32_0 : i32, i32
  }
  func.func @transform_4(%arg0: i32) -> (i32, i32) {
    %c0_i32 = arith.constant 0 : i32
    %c0_i32_0 = arith.constant 0 : i32
    %c0_i32_1 = arith.constant 0 : i32
    return %c0_i32, %c0_i32_0 : i32, i32
  }
  func.func @transform_5(%arg0: i32) -> (i32, i32) {
    %c0_i32 = arith.constant 0 : i32
    %c0_i32_0 = arith.constant 0 : i32
    %c0_i32_1 = arith.constant 0 : i32
    return %c0_i32, %c0_i32_0 : i32, i32
  }
  func.func @transform_6(%arg0: i32) -> (i32, i32) {
    %c0_i32 = arith.constant 0 : i32
    %c0_i32_0 = arith.constant 0 : i32
    return %arg0, %c0_i32 : i32, i32
  }
  func.func @transform_7(%arg0: i32) -> (i32, i32) {
    %c0_i32 = arith.constant 0 : i32
    %c0_i32_0 = arith.constant 0 : i32
    %c0_i32_1 = arith.constant 0 : i32
    return %c0_i32, %c0_i32_0 : i32, i32
  }
  func.func @transform_8(%arg0: i32) -> (i32, i32) {
    %c0_i32 = arith.constant 0 : i32
    %c0_i32_0 = arith.constant 0 : i32
    %c0_i32_1 = arith.constant 0 : i32
    return %c0_i32, %c0_i32_0 : i32, i32
  }
  func.func @transform_9(%arg0: i32) -> (i32, i32) {
    %c0_i32 = arith.constant 0 : i32
    %c0_i32_0 = arith.constant 0 : i32
    return %arg0, %c0_i32 : i32, i32
  }
}

</mosaic_0001>

<bundles_post_ra>
// kernel: audio_crnn_forward.5
= control target key start
LH: loop header
LB: loop body
LE: loop exit
PB: predicated region body
PF: predicated region fallthrough
CT: control target
= control target key end

     0   :  { %s777_s0 = inlined_call_operand.vmem [shape: bf16[128,128], index: 0, kind: input, shape index: {}]   ;;  %s778_s1 = inlined_call_operand.vmem [shape: bf16[256,128], index: 1, kind: input, shape index: {}]   ;;  %s779_s2 = inlined_call_operand.vmem [shape: bf16[32,128], index: 2, kind: input, shape index: {}]   ;;  %s780_s3 = inlined_call_operand.vmem [shape: f32[32,128], index: 3, kind: output, shape index: {}]  }
   0x1   :  { %v625_v0 = vld [vmem:[%s777_s0] sm:$0xff]   ;;  %v626_v1 = vld [vmem:[%s777_s0 + $0x8] sm:$0xff]   ;;  %v627_v2 = vld [vmem:[%s777_s0 + $0x10] sm:$0xff]  }
   0x2   :  { %557 = vmatprep.subr.bf16.mxu0 %v625_v0  ;;  %v628_v3 = vld [vmem:[%s777_s0 + $0x18] sm:$0xff]   ;;  %v633_v4 = vld [vmem:[%s778_s1] sm:$0xff]   ;;  %v630_v6 = vld [vmem:[%s777_s0 + $0x28] sm:$0xff]  }
   0x3   :  { %558 = vmatpush3.bf16.msra.mxu0 %v625_v0  ;;  %573 = vmatprep.mubr.bf16.mxu0 %v633_v4  ;;  %v629_v5 = vld [vmem:[%s777_s0 + $0x20] sm:$0xff]   ;;  %v631_v7 = vld [vmem:[%s777_s0 + $0x30] sm:$0xff]   ;;  %v632_v8 = vld [vmem:[%s777_s0 + $0x38] sm:$0xff]  }
   0x4   :  { %559 = vmatprep.subr.bf16.mxu0 %v626_v1  ;;  %v634_v9 = vld [vmem:[%s778_s1 + $0x8] sm:$0xff]   ;;  %v635_v10 = vld [vmem:[%s778_s1 + $0x10] sm:$0xff]   ;;  %v636_v11 = vld [vmem:[%s778_s1 + $0x18] sm:$0xff]  }
   0x5   :  { %v637_v12 = vld [vmem:[%s778_s1 + $0x20] sm:$0xff]   ;;  %v638_v13 = vld [vmem:[%s778_s1 + $0x28] sm:$0xff]   ;;  %v639_v14 = vld [vmem:[%s778_s1 + $0x30] sm:$0xff]  }
   0x6   :  { %v640_v15 = vld [vmem:[%s778_s1 + $0x38] sm:$0xff]   ;;  %v641_v16 = vld [vmem:[%s778_s1 + $0x40] sm:$0xff]   ;;  %v642_v17 = vld [vmem:[%s778_s1 + $0x48] sm:$0xff]  }
   0x7   :  { %560 = vmatpush3.bf16.msra.mxu0 %v626_v1  ;;  %v643_v18 = vld [vmem:[%s778_s1 + $0x50] sm:$0xff]   ;;  %v644_v19 = vld [vmem:[%s778_s1 + $0x58] sm:$0xff]   ;;  %v645_v20 = vld [vmem:[%s778_s1 + $0x60] sm:$0xff]  }
   0x8   :  { %561 = vmatprep.subr.bf16.mxu0 %v627_v2  ;;  %v646_v21 = vld [vmem:[%s778_s1 + $0x68] sm:$0xff]   ;;  %v647_v22 = vld [vmem:[%s778_s1 + $0x70] sm:$0xff]   ;;  %v648_v23 = vld [vmem:[%s778_s1 + $0x78] sm:$0xff]  }
   0x9   :  { %v649_v24 = vld [vmem:[%s779_s2] sm:$0xff]  }
   0xa   :  { %621 = vmatprep.mubr.bf16.mxu1 %v649_v24 }
   0xb   :  { %562 = vmatpush3.bf16.msra.mxu0 %v627_v2 }
   0xc   :  { %563 = vmatprep.subr.bf16.mxu0 %v628_v3 }
   0xf   :  { %564 = vmatpush3.bf16.msra.mxu0 %v628_v3 }
  0x10   :  { %565 = vmatprep.subr.bf16.mxu0 %v629_v5 }
  0x13   :  { %566 = vmatpush3.bf16.msra.mxu0 %v629_v5 }
  0x14   :  { %567 = vmatprep.subr.bf16.mxu0 %v630_v6 }
  0x17   :  { %568 = vmatpush3.bf16.msra.mxu0 %v630_v6 }
  0x18   :  { %569 = vmatprep.subr.bf16.mxu0 %v631_v7 }
  0x1b   :  { %570 = vmatpush3.bf16.msra.mxu0 %v631_v7 }
  0x1c   :  { %571 = vmatprep.subr.bf16.mxu0 %v632_v8 }
  0x1f   :  { %572 = vmatpush3.bf16.msra.mxu0 %v632_v8 }
  0x22   :  { %574 = vmatmul.mubr.bf16.vlgmr.msra.gmra.mrb[0].mxu0 %v634_v9 }
  0x23   :  { %577 = vmatprep.mubr.bf16.mxu0 %v635_v10 }
  0x2a   :  { %578 = vmatmul.mubr.bf16.gmra.mrb[4].mxu0 %v636_v11 }
  0x2b   :  { %581 = vmatprep.mubr.bf16.mxu0 %v637_v12 }
  0x32   :  { %582 = vmatmul.mubr.bf16.gmra.mrb[8].mxu0 %v638_v13 }
  0x33   :  { %585 = vmatprep.mubr.bf16.mxu0 %v639_v14 }
  0x3a   :  { %586 = vmatmul.mubr.bf16.gmra.mrb[12].mxu0 %v640_v15 }
  0x3b   :  { %589 = vmatprep.mubr.bf16.mxu0 %v641_v16 }
  0x42   :  { %590 = vmatmul.mubr.bf16.gmra.mrb[16].mxu0 %v642_v17 }
  0x43   :  { %593 = vmatprep.mubr.bf16.mxu0 %v643_v18 }
  0x4a   :  { %594 = vmatmul.mubr.bf16.gmra.mrb[20].mxu0 %v644_v19 }
  0x4b   :  { %597 = vmatprep.mubr.bf16.mxu0 %v645_v20 }
  0x52   :  { %598 = vmatmul.mubr.bf16.gmra.mrb[24].mxu0 %v646_v21 }
  0x53   :  { %601 = vmatprep.mubr.bf16.mxu0 %v647_v22 }
  0x5a   :  { %602 = vmatmul.mubr.bf16.gmra.mrb[28].mxu0 %v648_v23 }
  0xf5   :  { %v575_v25 = vpop.f32.mrb[0].mxu0 }
  0xf6   :  { %v241_v26 = vpop.f32.mrb[1].mxu0  ;;  %v370_v42 = vmul.f32 %v575_v25, %v575_v25 }
  0xf7   :  { %v576_v27 = vpop.f32.mrb[2].mxu0  ;;  %v368_v45 = vmul.f32 %v241_v26, %v241_v26 }
  0xf8   :  { %v244_v28 = vpop.f32.mrb[3].mxu0  ;;  %v371_v48 = vmul.f32 %v576_v27, %v576_v27 }
  0xf9   :  { %v369_v52 = vmul.f32 %v244_v28, %v244_v28 }
  0xfd   :  { %v579_v29 = vpop.f32.mrb[4].mxu0 }
  0xfe   :  { %v257_v30 = vpop.f32.mrb[5].mxu0  ;;  %v374_v60 = vmul.f32 %v579_v29, %v579_v29 }
  0xff   :  { %v580_v31 = vpop.f32.mrb[6].mxu0  ;;  %v372_v63 = vmul.f32 %v257_v30, %v257_v30 }
 0x100   :  { %v260_v32 = vpop.f32.mrb[7].mxu0  ;;  %v375_v2 = vmul.f32 %v580_v31, %v580_v31 }
 0x101   :  { %v373_v6 = vmul.f32 %v260_v32, %v260_v32 }
 0x105   :  { %v583_v33 = vpop.f32.mrb[8].mxu0 }
 0x106   :  { %v273_v34 = vpop.f32.mrb[9].mxu0  ;;  %v378_v14 = vmul.f32 %v583_v33, %v583_v33 }
 0x107   :  { %v584_v35 = vpop.f32.mrb[10].mxu0  ;;  %v376_v17 = vmul.f32 %v273_v34, %v273_v34 }
 0x108   :  { %v276_v36 = vpop.f32.mrb[11].mxu0  ;;  %v379_v20 = vmul.f32 %v584_v35, %v584_v35 }
 0x109   :  { %v377_v24 = vmul.f32 %v276_v36, %v276_v36 }
 0x10d   :  { %v746_v37 = vpop.f32.mrb[12].mxu0 }
 0x10e   :  { %v748_v38 = vpop.f32.mrb[13].mxu0  ;;  %v382_v32 = vmul.f32 %v746_v37, %v746_v37 }
 0x10f   :  { %v750_v39 = vpop.f32.mrb[14].mxu0  ;;  %v380_v35 = vmul.f32 %v748_v38, %v748_v38 }
 0x110   :  { %v752_v40 = vpop.f32.mrb[15].mxu0  ;;  %v383_v36 = vmul.f32 %v750_v39, %v750_v39  ;;  %v650_v39 = vld [vmem:[%s779_s2 + $0x8] sm:$0xff]  }
 0x115   :  { %v591_v41 = vpop.f32.mrb[16].mxu0 }
 0x116   :  { %v386_v43 = vmul.f32 %v591_v41, %v591_v41  ;;  %v305_v44 = vpop.f32.mrb[17].mxu0 }
 0x117   :  { %v384_v46 = vmul.f32 %v305_v44, %v305_v44  ;;  %v592_v47 = vpop.f32.mrb[18].mxu0 }
 0x118   :  { %v402_v49 = vadd.f32 %v386_v43, %v370_v42  ;;  %v387_v50 = vmul.f32 %v592_v47, %v592_v47  ;;  %v308_v51 = vpop.f32.mrb[19].mxu0 }
 0x119   :  { %v400_v53 = vadd.f32 %v384_v46, %v368_v45  ;;  %v385_v54 = vmul.f32 %v308_v51, %v308_v51  ;;  %v381_v46 = vmul.f32 %v752_v40, %v752_v40 }
 0x11a   :  { %v403_v55 = vadd.f32 %v387_v50, %v371_v48 }
 0x11b   :  { %v401_v56 = vadd.f32 %v385_v54, %v369_v52 }
 0x11c   :  { %v417_v57 = vpack.c.bf16 %v403_v55, %v402_v49 }
 0x11d   :  { %v595_v58 = vpop.f32.mrb[20].mxu0  ;;  %v416_v59 = vpack.c.bf16 %v401_v56, %v400_v53 }
 0x11e   :  { %v390_v61 = vmul.f32 %v595_v58, %v595_v58  ;;  %v321_v62 = vpop.f32.mrb[21].mxu0 }
 0x11f   :  { %v388_v0 = vmul.f32 %v321_v62, %v321_v62  ;;  %v596_v1 = vpop.f32.mrb[22].mxu0  ;;  %605 = vmatprep.subr.bf16.mxu1 %v416_v59 }
 0x120   :  { %v406_v3 = vadd.f32 %v390_v61, %v374_v60  ;;  %v391_v4 = vmul.f32 %v596_v1, %v596_v1  ;;  %v324_v5 = vpop.f32.mrb[23].mxu0  ;;  %606 = vmatpush3.bf16.msra.mxu1 %v416_v59 }
 0x121   :  { %v404_v7 = vadd.f32 %v388_v0, %v372_v63  ;;  %v389_v8 = vmul.f32 %v324_v5, %v324_v5  ;;  %607 = vmatprep.subr.bf16.mxu1 %v417_v57 }
 0x122   :  { %v407_v9 = vadd.f32 %v391_v4, %v375_v2 }
 0x123   :  { %v405_v10 = vadd.f32 %v389_v8, %v373_v6 }
 0x124   :  { %608 = vmatpush3.bf16.msra.mxu1 %v417_v57  ;;  %v419_v11 = vpack.c.bf16 %v407_v9, %v406_v3 }
 0x125   :  { %v599_v12 = vpop.f32.mrb[24].mxu0  ;;  %v418_v13 = vpack.c.bf16 %v405_v10, %v404_v7 }
 0x126   :  { %v394_v15 = vmul.f32 %v599_v12, %v599_v12  ;;  %v337_v16 = vpop.f32.mrb[25].mxu0 }
 0x127   :  { %v392_v18 = vmul.f32 %v337_v16, %v337_v16  ;;  %v600_v19 = vpop.f32.mrb[26].mxu0  ;;  %609 = vmatprep.subr.bf16.mxu1 %v418_v13 }
 0x128   :  { %v410_v21 = vadd.f32 %v394_v15, %v378_v14  ;;  %v395_v22 = vmul.f32 %v600_v19, %v600_v19  ;;  %v340_v23 = vpop.f32.mrb[27].mxu0  ;;  %610 = vmatpush3.bf16.msra.mxu1 %v418_v13 }
 0x129   :  { %v408_v25 = vadd.f32 %v392_v18, %v376_v17  ;;  %v393_v26 = vmul.f32 %v340_v23, %v340_v23  ;;  %611 = vmatprep.subr.bf16.mxu1 %v419_v11 }
 0x12a   :  { %v411_v27 = vadd.f32 %v395_v22, %v379_v20 }
 0x12b   :  { %v409_v28 = vadd.f32 %v393_v26, %v377_v24 }
 0x12c   :  { %612 = vmatpush3.bf16.msra.mxu1 %v419_v11  ;;  %v421_v29 = vpack.c.bf16 %v411_v27, %v410_v21 }
 0x12d   :  { %v603_v30 = vpop.f32.mrb[28].mxu0  ;;  %v420_v31 = vpack.c.bf16 %v409_v28, %v408_v25 }
 0x12e   :  { %v398_v33 = vmul.f32 %v603_v30, %v603_v30  ;;  %v353_v34 = vpop.f32.mrb[29].mxu0 }
 0x12f   :  { %v396_v41 = vmul.f32 %v353_v34, %v353_v34  ;;  %v604_v42 = vpop.f32.mrb[30].mxu0  ;;  %613 = vmatprep.subr.bf16.mxu1 %v420_v31 }
 0x130   :  { %v414_v43 = vadd.f32 %v398_v33, %v382_v32  ;;  %v399_v44 = vmul.f32 %v604_v42, %v604_v42  ;;  %v356_v45 = vpop.f32.mrb[31].mxu0  ;;  %614 = vmatpush3.bf16.msra.mxu1 %v420_v31 }
 0x131   :  { %v412_v47 = vadd.f32 %v396_v41, %v380_v35  ;;  %v397_v37 = vmul.f32 %v356_v45, %v356_v45  ;;  %615 = vmatprep.subr.bf16.mxu1 %v421_v29 }
 0x132   :  { %v415_v48 = vadd.f32 %v399_v44, %v383_v36 }
 0x133   :  { %v413_v49 = vadd.f32 %v397_v37, %v381_v46 }
 0x134   :  { %616 = vmatpush3.bf16.msra.mxu1 %v421_v29  ;;  %v423_v38 = vpack.c.bf16 %v415_v48, %v414_v43 }
 0x135   :  { %v422_v50 = vpack.c.bf16 %v413_v49, %v412_v47 }
 0x137   :  { %617 = vmatprep.subr.bf16.mxu1 %v422_v50 }
 0x138   :  { %618 = vmatpush3.bf16.msra.mxu1 %v422_v50 }
 0x139   :  { %619 = vmatprep.subr.bf16.mxu1 %v423_v38 }
 0x13c   :  { %620 = vmatpush3.bf16.msra.mxu1 %v423_v38 }
 0x13f   :  { %622 = vmatmul.mubr.bf16.vlgmr.msra.gmra.mrb[0].mxu1 %v650_v39 }
 0x212   :  { %v623_v51 = vpop.f32.mrb[0].mxu1 }
 0x213   :  { %491 = vst [vmem:[%s780_s3 + $0x10] sm:$0xff] %v623_v51  ;;  %v474_v40 = vpop.f32.mrb[1].mxu1 }
 0x214   :  { %489 = vst [vmem:[%s780_s3] sm:$0xff] %v474_v40  ;;  %v624_v52 = vpop.f32.mrb[2].mxu1 }
 0x215   :  { %492 = vst [vmem:[%s780_s3 + $0x18] sm:$0xff] %v624_v52  ;;  %v477_v53 = vpop.f32.mrb[3].mxu1 }
 0x216   :  { %490 = vst [vmem:[%s780_s3 + $0x8] sm:$0xff] %v477_v53 }

// kernel: audio_crnn_forward.6
= control target key start
LH: loop header
LB: loop body
LE: loop exit
PB: predicated region body
PF: predicated region fallthrough
CT: control target
= control target key end

     0   :  { %v14_v0 = vlaneseq  ;;  %v106_v1 = vmov 1983009808   ;;  %vm29_vm0 = vcmask 1041408   ;;  %vm33_vm1 = vcmask 254976   ;;  %s131_s0 = inlined_call_operand.vmem [shape: f32[2,288], index: 0, kind: input, shape index: {}]   ;;  %s132_s1 = inlined_call_operand.vmem [shape: f32[2,288], index: 1, kind: output, shape index: {}]  }
   0x1   :  { %v12_v2 = vunpack.c.l.s4 %v106_v1  ;;  %v8_v3 = vld [vmem:[%s131_s0] sm:$0x3f]  ;;  %v107_v16 = vmov 269488144   ;;  %vm92_vm2 = vcmask 1043458   ;;  %vm94_vm4 = vcmask 259076  }
   0x2   :  { %v15_v4 = vshrl.u32 %v14_v0, 7  ;;  %v10_v5 = vcombine.high %v8_v3, %v8_v3  ;;  %v42_v17 = vunpack.c.l.s4 %v107_v16  ;;  %vm93_vm3 = vmor %vm92_vm2, %vm29_vm0 }
   0x3   :  { %v13_v6 = vunpack.c.0.s8 %v12_v2  ;;  %vm95_vm5 = vmor %vm94_vm4, %vm93_vm3 }
   0x4   :  { %v43_v18 = vunpack.c.0.s8 %v42_v17 }
   0x5   :  { %v16_v7 = vsub.s32 %v13_v6, %v15_v4 }
   0x6   :  { %v46_v19 = vsub.s32 %v43_v18, %v15_v4 }
   0x7   :  { %v17_v8 = vrot.slane %v8_v3, %v16_v7  ;;  %v24_v9 = vrot.slane %v10_v5, %v16_v7 }
   0x9   :  { %v25_v10 = vcombine.high %v17_v8, %v17_v8  ;;  %v30_v11 = vsel %vm29_vm0, %v17_v8, 0.0  ;;  %v34_v13 = vsel %vm33_vm1, %v24_v9, 0.0 }
   0xb   :  { %v31_v12 = vsel %vm29_vm0, %v25_v10, 0.0 }
   0xc   :  { %v32_v14 = vadd.f32 %v31_v12, %v30_v11 }
   0xe   :  { %v35_v15 = vadd.f32 %v34_v13, %v32_v14 }
  0x10   :  { %36 = vadd.xlane.f32.xlu0 %v35_v15 }
  0x9d   :  { %v37_v20 = vpop.xlane.xlu0 %36 }
  0x9e   :  { %v39_v21 = vmul.f32 0.0034722222, %v37_v20 }
  0xa0   :  { %v47_v22 = vrot.slane %v39_v21, %v46_v19 }
  0xa2   :  { %v49_v23 = vsub.f32 %v8_v3, %v47_v22 }
  0xa4   :  { %v50_v24 = vmul.f32 %v49_v23, %v49_v23 }
  0xa6   :  { %v52_v25 = vcombine.high %v50_v24, %v50_v24  ;;  %v59_v26 = vrot.slane %v50_v24, %v16_v7 }
  0xa8   :  { %v66_v27 = vrot.slane %v52_v25, %v16_v7  ;;  %v67_v28 = vcombine.high %v59_v26, %v59_v26  ;;  %v71_v29 = vsel %vm29_vm0, %v59_v26, 0.0 }
  0xaa   :  { %v72_v30 = vsel %vm29_vm0, %v67_v28, 0.0  ;;  %v74_v32 = vsel %vm33_vm1, %v66_v27, 0.0 }
  0xab   :  { %v73_v31 = vadd.f32 %v72_v30, %v71_v29 }
  0xad   :  { %v75_v33 = vadd.f32 %v74_v32, %v73_v31 }
  0xaf   :  { %76 = vadd.xlane.f32.xlu0 %v75_v33 }
 0x13c   :  { %v77_v34 = vpop.xlane.xlu0 %76 }
 0x13d   :  { %v79_v35 = vmul.f32 0.0034843206, %v77_v34 }
 0x13f   :  { %v80_v36 = vadd.f32 1e-12, %v79_v35 }
 0x141   :  { %104 = vrsqrt.f32 %v80_v36 }
 0x14b   :  { %v105_v37 = vpop.eup %104 }
 0x14c   :  { %v89_v38 = vrot.slane %v105_v37, %v46_v19 }
 0x14e   :  { %v91_v39 = vmul.f32 %v89_v38, %v49_v23 }
 0x150   :  { %96 = vst.msk [vmem:[%s132_s1] sm:$0x3f] %vm95_vm5, %v91_v39 }

// kernel: audio_crnn_forward.7
= control target key start
LH: loop header
LB: loop body
LE: loop exit
PB: predicated region body
PF: predicated region fallthrough
CT: control target
= control target key end

     0   :  { %vm49_vm0 = vcmask 1043456   ;;  %vm50_vm1 = vcmask 1044480   ;;  %v375_v0 = vmov 0.0   ;;  %v376_v2 = vmov 65535   ;;  %s457_s1 = inlined_call_operand.vmem [shape: bf16[9,128], index: 1, kind: input, shape index: {}]   ;;  %s458_s2 = inlined_call_operand.vmem [shape: bf16[9,128], index: 2, kind: input, shape index: {}]   ;;  %s459_s0 = inlined_call_operand.vmem [shape: bf16[16,9], index: 0, kind: input, shape index: {}]   ;;  %s460_s3 = inlined_call_operand.vmem [shape: bf16[9,128], index: 3, kind: input, shape index: {}]   ;;  %s461_s4 = inlined_call_operand.vmem [shape: bf16[9,128], index: 4, kind: input, shape index: {}]   ;;  %s462_s5 = inlined_call_operand.vmem [shape: f32[16,1], index: 5, kind: input, shape index: {}]   ;;  %s463_s6 = inlined_call_operand.vmem [shape: f32[16,1], index: 6, kind: input, shape index: {}]   ;;  %s464_s7 = inlined_call_operand.vmem [shape: bf16[16,128], index: 7, kind: output, shape index: {}]  }
   0x1   :  { %340 = vmatprep.subr.bf16.mxu0 %v375_v0  ;;  %346 = vmatprep.subr.bf16.mxu1 %v375_v0  ;;  %v370_v1 = vld [vmem:[%s457_s1] sm:$0x1f]   ;;  %v51_v3 = vsel %vm49_vm0, 4294967295, %v376_v2  ;;  %vm377_vm2 = vmmov 0   ;;  %v378_v10 = vmov 0   ;;  %vm45_vm3 = vcmask 72704  }
   0x2   :  { %v52_v4 = vsel %vm50_vm1, %v51_v3, 0  ;;  %v371_v5 = vld [vmem:[%s458_s2] sm:$0x1f]   ;;  %342 = vmatprep.mubr.msk.bf16.mxu0 %vm377_vm2, %v375_v0  ;;  %348 = vmatprep.mubr.msk.bf16.mxu1 %vm377_vm2, %v375_v0  ;;  %v30_v16 = vld [vmem:[%s462_s5 + $0x8] sm:$0xff] }
   0x3   :  { %v54_v6 = vand.u32 %v370_v1, %v52_v4  ;;  %v372_v7 = vld [vmem:[%s459_s0] sm:$0xff]   ;;  %v131_v8 = vand.u32 %v371_v5, %v52_v4  ;;  %368 = vset.pattern.permute.xlu0 %v378_v10  ;;  %369 = vset.pattern.permute.xlu1 %v378_v10  ;;  %v32_v17 = vld [vmem:[%s463_s6 + $0x8] sm:$0xff] }
   0x4   :  { %v373_v9 = vld [vmem:[%s460_s3] sm:$0x1f]  }
   0x5   :  { %341 = vmatpush3.bf16.msra.mxu0 %v54_v6  ;;  %v374_v11 = vld [vmem:[%s461_s4] sm:$0x1f]   ;;  %347 = vmatpush3.bf16.msra.mxu1 %v131_v8  ;;  %v190_v13 = vand.u32 %v373_v9, %v52_v4 }
   0x6   :  { %v29_v12 = vld [vmem:[%s462_s5] sm:$0xff]  ;;  %352 = vmatprep.subr.bf16.mxu0 %v375_v0  ;;  %358 = vmatprep.subr.bf16.mxu1 %v375_v0  ;;  %v249_v15 = vand.u32 %v374_v11, %v52_v4 }
   0x7   :  { %v31_v14 = vld [vmem:[%s463_s6] sm:$0xff]  ;;  %99 = vperm.xlu0 %368, %v29_v12  }
   0x8   :  { %343 = vmatmul.mubr.msk.bf16.vlgmr.msra.gmra.mrb[0].mxu0 %vm45_vm3, %v372_v7  ;;  %111 = vperm.xlu1 %369, %v31_v14  }
   0x9   :  { %349 = vmatmul.mubr.msk.bf16.vlgmr.msra.gmra.mrb[0].mxu1 %vm45_vm3, %v372_v7  ;;  %353 = vmatpush3.bf16.msra.mxu0 %v190_v13 }
   0xa   :  { %359 = vmatpush3.bf16.msra.mxu1 %v249_v15  ;;  %354 = vmatprep.mubr.msk.bf16.mxu0 %vm377_vm2, %v375_v0 }
   0xb   :  { %360 = vmatprep.mubr.msk.bf16.mxu1 %vm377_vm2, %v375_v0  ;;  %104 = vperm.xlu0 %368, %v30_v16  }
   0xc   :  { %116 = vperm.xlu1 %369, %v32_v17  }
  0x10   :  { %355 = vmatmul.mubr.msk.bf16.vlgmr.msra.gmra.mrb[4].mxu0 %vm45_vm3, %v372_v7 }
  0x11   :  { %361 = vmatmul.mubr.msk.bf16.vlgmr.msra.gmra.mrb[4].mxu1 %vm45_vm3, %v372_v7 }
  0x86   :  { %v100_v18 = vpop.permute.xlu0 %99 }
  0x87   :  { %v112_v19 = vpop.permute.xlu1 %111 }
  0x8a   :  { %v105_v20 = vpop.permute.xlu0 %104 }
  0x8b   :  { %v117_v22 = vpop.permute.xlu1 %116 }
  0xdb   :  { %v90_v21 = vpop.f32.mrb[0].mxu0 }
  0xdc   :  { %v107_v23 = vmul.f32 %v100_v18, %v90_v21  ;;  %v167_v24 = vpop.f32.mrb[0].mxu1  ;;  %v344_v25 = vpop.f32.mrb[1].mxu0 }
  0xdd   :  { %v174_v26 = vmul.f32 %v167_v24, %v100_v18  ;;  %v350_v27 = vpop.f32.mrb[1].mxu1  ;;  %v93_v28 = vpop.f32.mrb[2].mxu0 }
  0xde   :  { %v119_v29 = vadd.f32 %v112_v19, %v107_v23  ;;  %v108_v30 = vmul.f32 %v105_v20, %v93_v28  ;;  %v170_v31 = vpop.f32.mrb[2].mxu1  ;;  %v345_v32 = vpop.f32.mrb[3].mxu0 }
  0xdf   :  { %v176_v33 = vadd.f32 %v174_v26, %v112_v19  ;;  %v175_v34 = vmul.f32 %v170_v31, %v105_v20  ;;  %v351_v35 = vpop.f32.mrb[3].mxu1 }
  0xe0   :  { %v121_v36 = vmax.f32 %v119_v29, 0.0  ;;  %v120_v37 = vadd.f32 %v117_v22, %v108_v30 }
  0xe1   :  { %v178_v38 = vmax.f32 %v176_v33, 0.0  ;;  %v177_v39 = vadd.f32 %v175_v34, %v117_v22 }
  0xe2   :  { %v122_v40 = vmax.f32 %v120_v37, 0.0 }
  0xe3   :  { %v180_v41 = vmax.f32 %v121_v36, %v178_v38  ;;  %v179_v42 = vmax.f32 %v177_v39, 0.0  ;;  %v226_v43 = vpop.f32.mrb[4].mxu0 }
  0xe4   :  { %v233_v44 = vmul.f32 %v226_v43, %v100_v18  ;;  %v285_v45 = vpop.f32.mrb[4].mxu1  ;;  %v356_v46 = vpop.f32.mrb[5].mxu0 }
  0xe5   :  { %v181_v47 = vmax.f32 %v122_v40, %v179_v42  ;;  %v292_v48 = vmul.f32 %v285_v45, %v100_v18  ;;  %v362_v49 = vpop.f32.mrb[5].mxu1  ;;  %v229_v50 = vpop.f32.mrb[6].mxu0 }
  0xe6   :  { %v235_v51 = vadd.f32 %v233_v44, %v112_v19  ;;  %v234_v52 = vmul.f32 %v229_v50, %v105_v20  ;;  %v288_v53 = vpop.f32.mrb[6].mxu1  ;;  %v357_v54 = vpop.f32.mrb[7].mxu0 }
  0xe7   :  { %v294_v55 = vadd.f32 %v292_v48, %v112_v19  ;;  %v293_v56 = vmul.f32 %v288_v53, %v105_v20  ;;  %v363_v57 = vpop.f32.mrb[7].mxu1 }
  0xe8   :  { %v237_v58 = vmax.f32 %v235_v51, 0.0  ;;  %v236_v59 = vadd.f32 %v234_v52, %v117_v22 }
  0xe9   :  { %v295_v60 = vadd.f32 %v293_v56, %v117_v22  ;;  %v296_v62 = vmax.f32 %v294_v55, 0.0 }
  0xea   :  { %v239_v61 = vmax.f32 %v180_v41, %v237_v58  ;;  %v238_v63 = vmax.f32 %v236_v59, 0.0 }
  0xeb   :  { %v297_v2 = vmax.f32 %v295_v60, 0.0 }
  0xec   :  { %v298_v0 = vmax.f32 %v239_v61, %v296_v62  ;;  %v240_v1 = vmax.f32 %v181_v47, %v238_v63 }
  0xee   :  { %v299_v3 = vmax.f32 %v240_v1, %v297_v2 }
  0xf0   :  { %v330_v4 = vpack.c.bf16 %v299_v3, %v298_v0 }
  0xf2   :  { %331 = vst [vmem:[%s464_s7] sm:$0xff] %v330_v4  }

// kernel: audio_crnn_forward.8
= control target key start
LH: loop header
LB: loop body
LE: loop exit
PB: predicated region body
PF: predicated region fallthrough
CT: control target
= control target key end

     0   :  { %v784_v0 = vmov 0   ;;  %vm129_vm0 = vcmask 130048   ;;  %s1069_s1 = inlined_call_operand.vmem [shape: bf16[144,128], index: 1, kind: input, shape index: {}]   ;;  %s1070_s2 = inlined_call_operand.vmem [shape: bf16[144,128], index: 2, kind: input, shape index: {}]   ;;  %s1071_s0 = inlined_call_operand.vmem [shape: bf16[32,144], index: 0, kind: input, shape index: {}]   ;;  %s1072_s3 = inlined_call_operand.vmem [shape: bf16[144,128], index: 3, kind: input, shape index: {}]   ;;  %s1073_s4 = inlined_call_operand.vmem [shape: bf16[144,128], index: 4, kind: input, shape index: {}]   ;;  %s1074_s5 = inlined_call_operand.vmem [shape: f32[32,1], index: 5, kind: input, shape index: {}]   ;;  %s1075_s6 = inlined_call_operand.vmem [shape: f32[32,1], index: 6, kind: input, shape index: {}]   ;;  %s1076_s7 = inlined_call_operand.vmem [shape: bf16[32,128], index: 7, kind: output, shape index: {}]  }
   0x1   :  { %136 = vmatprep.subr.bf16.mxu0 %v784_v0  ;;  %309 = vmatprep.subr.bf16.mxu1 %v784_v0  ;;  %v742_v1 = vld [vmem:[%s1069_s1] sm:$0xff]   ;;  %v744_v3 = vld [vmem:[%s1069_s1 + $0x8] sm:$0xff]   ;;  %v746_v5 = vld [vmem:[%s1069_s1 + $0x10] sm:$0xff]  }
   0x2   :  { %v743_v2 = vld [vmem:[%s1070_s2] sm:$0xff]   ;;  %740 = vset.pattern.permute.xlu0 %v784_v0  ;;  %741 = vset.pattern.permute.xlu1 %v784_v0  ;;  %v745_v4 = vld [vmem:[%s1070_s2 + $0x8] sm:$0xff]   ;;  %v747_v6 = vld [vmem:[%s1070_s2 + $0x10] sm:$0xff]  }
   0x3   :  { %137 = vmatpush1.bf16.msra.mxu0 %v742_v1  ;;  %310 = vmatpush1.bf16.msra.mxu1 %v743_v2  ;;  %v748_v7 = vld [vmem:[%s1069_s1 + $0x18] sm:$0xff]   ;;  %v750_v9 = vld [vmem:[%s1069_s1 + $0x20] sm:$0xff]   ;;  %v752_v11 = vld [vmem:[%s1069_s1 + $0x28] sm:$0xff]  }
   0x4   :  { %138 = vmatprep.subr.bf16.mxu0 %v784_v0  ;;  %311 = vmatprep.subr.bf16.mxu1 %v784_v0  ;;  %v749_v8 = vld [vmem:[%s1070_s2 + $0x18] sm:$0xff]   ;;  %v751_v10 = vld [vmem:[%s1070_s2 + $0x20] sm:$0xff]   ;;  %v753_v13 = vld [vmem:[%s1070_s2 + $0x28] sm:$0xff]  }
   0x5   :  { %v873_v12 = vld [vmem:[%s1071_s0 + $0x4] ss:$8 sps:$4 sm:$0xff]   ;;  %v754_v14 = vld [vmem:[%s1069_s1 + $0x30] sm:$0xff]   ;;  %v756_v16 = vld [vmem:[%s1069_s1 + $0x38] sm:$0xff]  }
   0x6   :  { %685 = vmatprep.mubr.msk.bf16.mxu0 %vm129_vm0, %v873_v12  ;;  %696 = vmatprep.mubr.msk.bf16.mxu1 %vm129_vm0, %v873_v12  ;;  %v755_v15 = vld [vmem:[%s1070_s2 + $0x30] sm:$0xff]   ;;  %v757_v17 = vld [vmem:[%s1070_s2 + $0x38] sm:$0xff]   ;;  %v758_v18 = vld [vmem:[%s1069_s1 + $0x40] sm:$0xff]  }
   0x7   :  { %139 = vmatpush1.bf16.msra.mxu0 %v744_v3  ;;  %312 = vmatpush1.bf16.msra.mxu1 %v745_v4  ;;  %v759_v19 = vld [vmem:[%s1070_s2 + $0x40] sm:$0xff]   ;;  %v924_v23 = vld [vmem:[%s1071_s0 + $0x14] ss:$8 sps:$4 sm:$0xff]   ;;  %v765_v24 = vld [vmem:[%s1072_s3 + $0x8] sm:$0xff]  }
   0x8   :  { %140 = vmatprep.subr.bf16.mxu0 %v784_v0  ;;  %313 = vmatprep.subr.bf16.mxu1 %v784_v0  ;;  %v911_v20 = vld [vmem:[%s1071_s0] ss:$8 sps:$4 sm:$0xff]   ;;  %v33_v27 = vld [vmem:[%s1074_s5 + $0x10] sm:$0xff]  ;;  %v769_v32 = vld [vmem:[%s1072_s3 + $0x18] sm:$0xff]  }
   0x9   :  { %v763_v21 = vld [vmem:[%s1072_s3] sm:$0xff]   ;;  %v766_v26 = vld [vmem:[%s1073_s4 + $0x8] sm:$0xff]   ;;  %v947_v28 = vld [vmem:[%s1071_s0 + $0x10] ss:$8 sps:$4 sm:$0xff]   ;;  %197 = vperm.xlu1 %741, %v33_v27  }
   0xa   :  { %v764_v22 = vld [vmem:[%s1073_s4] sm:$0xff]   ;;  %v767_v29 = vld [vmem:[%s1072_s3 + $0x10] sm:$0xff]   ;;  %v32_v30 = vld [vmem:[%s1074_s5 + $0x8] sm:$0xff] }
   0xb   :  { %141 = vmatpush1.bf16.msra.mxu0 %v746_v5  ;;  %314 = vmatpush1.bf16.msra.mxu1 %v747_v6  ;;  %v31_v25 = vld [vmem:[%s1074_s5] sm:$0xff]  ;;  %v768_v31 = vld [vmem:[%s1073_s4 + $0x10] sm:$0xff]   ;;  %v34_v33 = vld [vmem:[%s1074_s5 + $0x18] sm:$0xff] }
   0xc   :  { %142 = vmatprep.subr.bf16.mxu0 %v784_v0  ;;  %315 = vmatprep.subr.bf16.mxu1 %v784_v0  ;;  %v770_v34 = vld [vmem:[%s1073_s4 + $0x18] sm:$0xff]   ;;  %v35_v35 = vld [vmem:[%s1075_s6] sm:$0xff]  ;;  %v36_v37 = vld [vmem:[%s1075_s6 + $0x8] sm:$0xff] }
   0xd   :  { %187 = vperm.xlu0 %740, %v31_v25   ;;  %202 = vperm.xlu1 %741, %v34_v33   ;;  %v771_v36 = vld [vmem:[%s1072_s3 + $0x20] sm:$0xff]   ;;  %v37_v39 = vld [vmem:[%s1075_s6 + $0x10] sm:$0xff]  ;;  %v773_v40 = vld [vmem:[%s1072_s3 + $0x28] sm:$0xff]  }
   0xe   :  { %v772_v38 = vld [vmem:[%s1073_s4 + $0x20] sm:$0xff]   ;;  %v38_v41 = vld [vmem:[%s1075_s6 + $0x18] sm:$0xff]  ;;  %v774_v42 = vld [vmem:[%s1073_s4 + $0x28] sm:$0xff]  }
   0xf   :  { %143 = vmatpush1.bf16.msra.mxu0 %v748_v7  ;;  %316 = vmatpush1.bf16.msra.mxu1 %v749_v8  ;;  %v778_v43 = vld [vmem:[%s1072_s3 + $0x30] sm:$0xff]   ;;  %v780_v45 = vld [vmem:[%s1072_s3 + $0x38] sm:$0xff]   ;;  %v782_v47 = vld [vmem:[%s1072_s3 + $0x40] sm:$0xff]  }
  0x10   :  { %144 = vmatprep.subr.bf16.mxu0 %v784_v0  ;;  %317 = vmatprep.subr.bf16.mxu1 %v784_v0  ;;  %v779_v44 = vld [vmem:[%s1073_s4 + $0x30] sm:$0xff]   ;;  %v781_v46 = vld [vmem:[%s1073_s4 + $0x38] sm:$0xff]   ;;  %v783_v48 = vld [vmem:[%s1073_s4 + $0x40] sm:$0xff]  }
  0x11   :  { %192 = vperm.xlu0 %740, %v32_v30   ;;  %216 = vperm.xlu1 %741, %v36_v37  }
  0x13   :  { %145 = vmatpush1.bf16.msra.mxu0 %v750_v9  ;;  %318 = vmatpush1.bf16.msra.mxu1 %v751_v10 }
  0x14   :  { %146 = vmatprep.subr.bf16.mxu0 %v784_v0  ;;  %319 = vmatprep.subr.bf16.mxu1 %v784_v0 }
  0x15   :  { %211 = vperm.xlu0 %740, %v35_v35   ;;  %226 = vperm.xlu1 %741, %v38_v41  }
  0x17   :  { %147 = vmatpush1.bf16.msra.mxu0 %v752_v11  ;;  %320 = vmatpush1.bf16.msra.mxu1 %v753_v13 }
  0x18   :  { %148 = vmatprep.subr.bf16.mxu0 %v784_v0  ;;  %321 = vmatprep.subr.bf16.mxu1 %v784_v0 }
  0x19   :  { %221 = vperm.xlu0 %740, %v37_v39  }
  0x1b   :  { %149 = vmatpush1.bf16.msra.mxu0 %v754_v14  ;;  %322 = vmatpush1.bf16.msra.mxu1 %v755_v15 }
  0x1c   :  { %150 = vmatprep.subr.bf16.mxu0 %v784_v0  ;;  %323 = vmatprep.subr.bf16.mxu1 %v784_v0 }
  0x1f   :  { %151 = vmatpush1.bf16.msra.mxu0 %v756_v16  ;;  %324 = vmatpush1.bf16.msra.mxu1 %v757_v17 }
  0x20   :  { %152 = vmatprep.subr.bf16.mxu0 %v784_v0  ;;  %325 = vmatprep.subr.bf16.mxu1 %v784_v0 }
  0x23   :  { %153 = vmatpush1.bf16.msra.mxu0 %v758_v18  ;;  %326 = vmatpush1.bf16.msra.mxu1 %v759_v19 }
  0x24   :  { %446 = vmatprep.subr.bf16.mxu0 %v784_v0  ;;  %583 = vmatprep.subr.bf16.mxu1 %v784_v0 }
  0x26   :  { %169 = vmatmul.mubr.bf16.vlgmr.msra.gmra.mrb[0].mxu0 %v911_v20  ;;  %342 = vmatmul.mubr.bf16.vlgmr.msra.gmra.mrb[0].mxu1 %v911_v20 }
  0x27   :  { %447 = vmatpush1.bf16.msra.mxu0 %v763_v21  ;;  %584 = vmatpush1.bf16.msra.mxu1 %v764_v22 }
  0x28   :  { %448 = vmatprep.subr.bf16.mxu0 %v784_v0  ;;  %585 = vmatprep.subr.bf16.mxu1 %v784_v0 }
  0x29   :  { %686 = vmatprep.mubr.msk.bf16.mxu0 %vm129_vm0, %v924_v23  ;;  %697 = vmatprep.mubr.msk.bf16.mxu1 %vm129_vm0, %v924_v23 }
  0x2b   :  { %449 = vmatpush1.bf16.msra.mxu0 %v765_v24  ;;  %586 = vmatpush1.bf16.msra.mxu1 %v766_v26 }
  0x2c   :  { %450 = vmatprep.subr.bf16.mxu0 %v784_v0  ;;  %587 = vmatprep.subr.bf16.mxu1 %v784_v0 }
  0x2e   :  { %177 = vmatmul.mubr.bf16.gmra.mrb[4].mxu0 %v947_v28  ;;  %350 = vmatmul.mubr.bf16.gmra.mrb[4].mxu1 %v947_v28 }
  0x2f   :  { %451 = vmatpush1.bf16.msra.mxu0 %v767_v29  ;;  %588 = vmatpush1.bf16.msra.mxu1 %v768_v31 }
  0x30   :  { %452 = vmatprep.subr.bf16.mxu0 %v784_v0  ;;  %589 = vmatprep.subr.bf16.mxu1 %v784_v0 }
  0x31   :  { %707 = vmatprep.mubr.msk.bf16.mxu0 %vm129_vm0, %v873_v12  ;;  %718 = vmatprep.mubr.msk.bf16.mxu1 %vm129_vm0, %v873_v12 }
  0x33   :  { %453 = vmatpush1.bf16.msra.mxu0 %v769_v32  ;;  %590 = vmatpush1.bf16.msra.mxu1 %v770_v34 }
  0x34   :  { %454 = vmatprep.subr.bf16.mxu0 %v784_v0  ;;  %591 = vmatprep.subr.bf16.mxu1 %v784_v0 }
  0x37   :  { %455 = vmatpush1.bf16.msra.mxu0 %v771_v36  ;;  %592 = vmatpush1.bf16.msra.mxu1 %v772_v38 }
  0x38   :  { %456 = vmatprep.subr.bf16.mxu0 %v784_v0  ;;  %593 = vmatprep.subr.bf16.mxu1 %v784_v0 }
  0x3b   :  { %457 = vmatpush1.bf16.msra.mxu0 %v773_v40  ;;  %594 = vmatpush1.bf16.msra.mxu1 %v774_v42 }
  0x3c   :  { %458 = vmatprep.subr.bf16.mxu0 %v784_v0  ;;  %595 = vmatprep.subr.bf16.mxu1 %v784_v0 }
  0x3f   :  { %459 = vmatpush1.bf16.msra.mxu0 %v778_v43  ;;  %596 = vmatpush1.bf16.msra.mxu1 %v779_v44 }
  0x40   :  { %460 = vmatprep.subr.bf16.mxu0 %v784_v0  ;;  %597 = vmatprep.subr.bf16.mxu1 %v784_v0 }
  0x43   :  { %461 = vmatpush1.bf16.msra.mxu0 %v780_v45  ;;  %598 = vmatpush1.bf16.msra.mxu1 %v781_v46 }
  0x44   :  { %462 = vmatprep.subr.bf16.mxu0 %v784_v0  ;;  %599 = vmatprep.subr.bf16.mxu1 %v784_v0 }
  0x47   :  { %463 = vmatpush1.bf16.msra.mxu0 %v782_v47  ;;  %600 = vmatpush1.bf16.msra.mxu1 %v783_v48 }
  0x4a   :  { %479 = vmatmul.mubr.bf16.vlgmr.msra.gmra.mrb[8].mxu0 %v911_v20  ;;  %616 = vmatmul.mubr.bf16.vlgmr.msra.gmra.mrb[8].mxu1 %v911_v20 }
  0x4b   :  { %708 = vmatprep.mubr.msk.bf16.mxu0 %vm129_vm0, %v924_v23  ;;  %719 = vmatprep.mubr.msk.bf16.mxu1 %vm129_vm0, %v924_v23 }
  0x52   :  { %487 = vmatmul.mubr.bf16.gmra.mrb[12].mxu0 %v947_v28  ;;  %624 = vmatmul.mubr.bf16.gmra.mrb[12].mxu1 %v947_v28 }
  0x88   :  { %v1039_v50 = vpop.permute.xlu1 %197 }
  0x8c   :  { %v188_v49 = vpop.permute.xlu0 %187  ;;  %v1041_v52 = vpop.permute.xlu1 %202 }
  0x90   :  { %v193_v51 = vpop.permute.xlu0 %192  ;;  %v217_v55 = vpop.permute.xlu1 %216 }
  0x94   :  { %v212_v53 = vpop.permute.xlu0 %211  ;;  %v1045_v13 = vpop.permute.xlu1 %226 }
  0x98   :  { %v1043_v10 = vpop.permute.xlu0 %221 }
  0xf9   :  { %v170_v54 = vpop.f32.mrb[0].mxu0  ;;  %v343_v57 = vpop.f32.mrb[0].mxu1 }
  0xfa   :  { %v205_v56 = vmul.f32 %v188_v49, %v170_v54  ;;  %v172_v58 = vpop.f32.mrb[1].mxu0  ;;  %v358_v59 = vmul.f32 %v343_v57, %v188_v49  ;;  %v345_v60 = vpop.f32.mrb[1].mxu1 }
  0xfb   :  { %v173_v61 = vpop.f32.mrb[2].mxu0  ;;  %v346_v63 = vpop.f32.mrb[2].mxu1 }
  0xfc   :  { %v206_v62 = vmul.f32 %v193_v51, %v173_v61  ;;  %v229_v0 = vadd.f32 %v212_v53, %v205_v56  ;;  %v175_v1 = vpop.f32.mrb[3].mxu0  ;;  %v359_v2 = vmul.f32 %v346_v63, %v193_v51  ;;  %v362_v3 = vadd.f32 %v358_v59, %v212_v53  ;;  %v348_v4 = vpop.f32.mrb[3].mxu1 }
  0xfe   :  { %v233_v5 = vmax.f32 %v229_v0, 0.0  ;;  %v230_v6 = vadd.f32 %v217_v55, %v206_v62  ;;  %v366_v7 = vmax.f32 %v362_v3, 0.0  ;;  %v363_v8 = vadd.f32 %v359_v2, %v217_v55 }
 0x100   :  { %v234_v9 = vmax.f32 %v230_v6, 0.0  ;;  %v367_v11 = vmax.f32 %v363_v8, 0.0  ;;  %v370_v14 = vmax.f32 %v233_v5, %v366_v7 }
 0x101   :  { %v178_v12 = vpop.f32.mrb[4].mxu0  ;;  %v351_v17 = vpop.f32.mrb[4].mxu1 }
 0x102   :  { %v207_v15 = vmul.f32 %v1039_v50, %v178_v12  ;;  %v180_v16 = vpop.f32.mrb[5].mxu0  ;;  %v360_v18 = vmul.f32 %v351_v17, %v1039_v50  ;;  %v353_v20 = vpop.f32.mrb[5].mxu1  ;;  %v371_v21 = vmax.f32 %v234_v9, %v367_v11 }
 0x103   :  { %v181_v19 = vpop.f32.mrb[6].mxu0  ;;  %v354_v24 = vpop.f32.mrb[6].mxu1 }
 0x104   :  { %v208_v22 = vmul.f32 %v1041_v52, %v181_v19  ;;  %v183_v23 = vpop.f32.mrb[7].mxu0  ;;  %v231_v25 = vadd.f32 %v1043_v10, %v207_v15  ;;  %v361_v26 = vmul.f32 %v354_v24, %v1041_v52  ;;  %v364_v27 = vadd.f32 %v360_v18, %v1043_v10  ;;  %v356_v28 = vpop.f32.mrb[7].mxu1 }
 0x106   :  { %v232_v29 = vadd.f32 %v1045_v13, %v208_v22  ;;  %v235_v30 = vmax.f32 %v231_v25, 0.0  ;;  %v365_v31 = vadd.f32 %v361_v26, %v1045_v13  ;;  %v368_v32 = vmax.f32 %v364_v27, 0.0 }
 0x108   :  { %v236_v33 = vmax.f32 %v232_v29, 0.0  ;;  %v369_v34 = vmax.f32 %v365_v31, 0.0  ;;  %v372_v35 = vmax.f32 %v235_v30, %v368_v32 }
 0x10a   :  { %v373_v36 = vmax.f32 %v236_v33, %v369_v34 }
 0x11d   :  { %v480_v37 = vpop.f32.mrb[8].mxu0  ;;  %v617_v39 = vpop.f32.mrb[8].mxu1 }
 0x11e   :  { %v495_v38 = vmul.f32 %v480_v37, %v188_v49  ;;  %v482_v40 = vpop.f32.mrb[9].mxu0  ;;  %v632_v41 = vmul.f32 %v617_v39, %v188_v49  ;;  %v619_v42 = vpop.f32.mrb[9].mxu1 }
 0x11f   :  { %v483_v43 = vpop.f32.mrb[10].mxu0  ;;  %v620_v46 = vpop.f32.mrb[10].mxu1 }
 0x120   :  { %v499_v44 = vadd.f32 %v495_v38, %v212_v53  ;;  %v496_v45 = vmul.f32 %v483_v43, %v193_v51  ;;  %v485_v47 = vpop.f32.mrb[11].mxu0  ;;  %v636_v48 = vadd.f32 %v632_v41, %v212_v53  ;;  %v633_v54 = vmul.f32 %v620_v46, %v193_v51  ;;  %v622_v56 = vpop.f32.mrb[11].mxu1 }
 0x122   :  { %v503_v57 = vmax.f32 %v499_v44, 0.0  ;;  %v500_v58 = vadd.f32 %v496_v45, %v217_v55  ;;  %v637_v59 = vadd.f32 %v633_v54, %v217_v55  ;;  %v640_v61 = vmax.f32 %v636_v48, 0.0 }
 0x124   :  { %v507_v60 = vmax.f32 %v370_v14, %v503_v57  ;;  %v504_v62 = vmax.f32 %v500_v58, 0.0  ;;  %v641_v2 = vmax.f32 %v637_v59, 0.0 }
 0x125   :  { %v488_v63 = vpop.f32.mrb[12].mxu0  ;;  %v625_v3 = vpop.f32.mrb[12].mxu1 }
 0x126   :  { %v644_v0 = vmax.f32 %v507_v60, %v640_v61  ;;  %v508_v1 = vmax.f32 %v371_v21, %v504_v62  ;;  %v497_v49 = vmul.f32 %v488_v63, %v1039_v50  ;;  %v490_v4 = vpop.f32.mrb[13].mxu0  ;;  %v634_v5 = vmul.f32 %v625_v3, %v1039_v50  ;;  %v627_v6 = vpop.f32.mrb[13].mxu1 }
 0x127   :  { %v491_v53 = vpop.f32.mrb[14].mxu0  ;;  %v628_v8 = vpop.f32.mrb[14].mxu1 }
 0x128   :  { %v645_v51 = vmax.f32 %v508_v1, %v641_v2  ;;  %v501_v7 = vadd.f32 %v497_v49, %v1043_v10  ;;  %v498_v55 = vmul.f32 %v491_v53, %v1041_v52  ;;  %v493_v9 = vpop.f32.mrb[15].mxu0  ;;  %v638_v11 = vadd.f32 %v634_v5, %v1043_v10  ;;  %v630_v14 = vpop.f32.mrb[15].mxu1 }
 0x129   :  { %v635_v12 = vmul.f32 %v628_v8, %v1041_v52 }
 0x12a   :  { %v731_v15 = vpack.c.bf16 %v645_v51, %v644_v0  ;;  %v505_v16 = vmax.f32 %v501_v7, 0.0  ;;  %v502_v17 = vadd.f32 %v498_v55, %v1045_v13  ;;  %v642_v19 = vmax.f32 %v638_v11, 0.0 }
 0x12b   :  { %v639_v50 = vadd.f32 %v635_v12, %v1045_v13 }
 0x12c   :  { %732 = vst [vmem:[%s1076_s7] sm:$0xff] %v731_v15   ;;  %v509_v18 = vmax.f32 %v372_v35, %v505_v16  ;;  %v506_v20 = vmax.f32 %v502_v17, 0.0 }
 0x12d   :  { %v643_v23 = vmax.f32 %v639_v50, 0.0 }
 0x12e   :  { %v646_v21 = vmax.f32 %v509_v18, %v642_v19  ;;  %v510_v22 = vmax.f32 %v373_v36, %v506_v20 }
 0x130   :  { %v647_v10 = vmax.f32 %v510_v22, %v643_v23 }
 0x132   :  { %v736_v24 = vpack.c.bf16 %v647_v10, %v646_v21 }
 0x134   :  { %738 = vst [vmem:[%s1076_s7 + $0x8] sm:$0xff] %v736_v24  }

// kernel: audio_crnn_forward.9
= control target key start
LH: loop header
LB: loop body
LE: loop exit
PB: predicated region body
PF: predicated region fallthrough
CT: control target
= control target key end

     0   :  { %v1119_v1 = vmov 0   ;;  %v69_v47 = vlaneseq  ;;  %vm359_vm0 = vcmask 523264   ;;  %vm1122_vm4 = vmmov 0   ;;  %s1478_s1 = inlined_call_operand.vmem [shape: bf16[256,256], index: 1, kind: input, shape index: {}]   ;;  %s1479_s2 = inlined_call_operand.vmem [shape: bf16[64,256], index: 2, kind: input, shape index: {}]   ;;  %s1480_s0 = inlined_call_operand.vmem [shape: bf16[2,8,256], index: 0, kind: input, shape index: {}]   ;;  %s1481_s3 = inlined_call_operand.vmem [shape: f32[1,256], index: 3, kind: input, shape index: {}]   ;;  %s1482_s4 = inlined_call_operand.vmem [shape: bf16[128,256], index: 4, kind: input, shape index: {}]   ;;  %s1483_s5 = inlined_call_operand.vmem [shape: f32[1,256], index: 5, kind: input, shape index: {}]   ;;  %s1484_s6 = inlined_call_operand.vmem [shape: s32[8,1], index: 6, kind: input, shape index: {}]   ;;  %s1485_s7 = inlined_call_operand.vmem [shape: bf16[64,10], index: 7, kind: input, shape index: {}]   ;;  %s1486_s8 = inlined_call_operand.vmem [shape: f32[1,10], index: 8, kind: input, shape index: {}]   ;;  %s1487_s9 = inlined_call_operand.vmem [shape: f32[8,10], index: 9, kind: output, shape index: {}]  }
   0x1   :  { %v976_v0 = vld [vmem:[%s1478_s1 + $0x4] ss:$8 sps:$4 sm:$0xff]   ;;  %395 = vmatprep.mubr.bf16.mxu1 %v1119_v1  ;;  %974 = vset.pattern.permute.xlu0 %v1119_v1  ;;  %v978_v2 = vld [vmem:[%s1478_s1] ss:$8 sps:$4 sm:$0xff]   ;;  %v979_v3 = vld [vmem:[%s1478_s1 + $0x14] ss:$8 sps:$4 sm:$0xff]  }
   0x2   :  { %975 = vset.pattern.permute.xlu1 %v1119_v1  ;;  %249 = vmatprep.subr.bf16.mxu0 %v976_v0  ;;  %v981_v4 = vld [vmem:[%s1478_s1 + $0x10] ss:$8 sps:$4 sm:$0xff]   ;;  %v982_v5 = vld [vmem:[%s1478_s1 + $0x24] ss:$8 sps:$4 sm:$0xff]   ;;  %v984_v6 = vld [vmem:[%s1478_s1 + $0x20] ss:$8 sps:$4 sm:$0xff]  }
   0x3   :  { %250 = vmatpush1.bf16.msra.mxu0 %v978_v2  ;;  %v985_v7 = vld [vmem:[%s1478_s1 + $0x34] ss:$8 sps:$4 sm:$0xff]   ;;  %v987_v8 = vld [vmem:[%s1478_s1 + $0x30] ss:$8 sps:$4 sm:$0xff]   ;;  %v988_v9 = vld [vmem:[%s1478_s1 + $0x44] ss:$8 sps:$4 sm:$0xff]  }
   0x4   :  { %251 = vmatprep.subr.bf16.mxu0 %v979_v3  ;;  %v990_v10 = vld [vmem:[%s1478_s1 + $0x40] ss:$8 sps:$4 sm:$0xff]   ;;  %v991_v11 = vld [vmem:[%s1478_s1 + $0x54] ss:$8 sps:$4 sm:$0xff]   ;;  %v1212_v12 = vld [vmem:[%s1479_s2 + $0x4] ss:$8 sps:$4 sm:$0xff]  }
   0x5   :  { %v993_v13 = vld [vmem:[%s1478_s1 + $0x50] ss:$8 sps:$4 sm:$0xff]   ;;  %363 = vmatprep.subr.bf16.mxu1 %v1212_v12  ;;  %v1221_v14 = vld [vmem:[%s1479_s2] ss:$8 sps:$4 sm:$0xff]   ;;  %v1226_v15 = vld [vmem:[%s1479_s2 + $0x14] ss:$8 sps:$4 sm:$0xff]  }
   0x6   :  { %v994_v16 = vld [vmem:[%s1478_s1 + $0x64] ss:$8 sps:$4 sm:$0xff]   ;;  %364 = vmatpush1.bf16.msra.mxu1 %v1221_v14  ;;  %v1235_v17 = vld [vmem:[%s1479_s2 + $0x10] ss:$8 sps:$4 sm:$0xff]   ;;  %v996_v19 = vld [vmem:[%s1478_s1 + $0x60] ss:$8 sps:$4 sm:$0xff]  }
   0x7   :  { %252 = vmatpush1.bf16.msra.mxu0 %v981_v4  ;;  %365 = vmatprep.subr.bf16.mxu1 %v1226_v15  ;;  %v1241_v18 = vld [vmem:[%s1479_s2 + $0x24] ss:$8 sps:$4 sm:$0xff]   ;;  %v997_v20 = vld [vmem:[%s1478_s1 + $0x74] ss:$8 sps:$4 sm:$0xff]   ;;  %v1253_v21 = vld [vmem:[%s1479_s2 + $0x20] ss:$8 sps:$4 sm:$0xff]  }
   0x8   :  { %253 = vmatprep.subr.bf16.mxu0 %v982_v5  ;;  %v1259_v22 = vld [vmem:[%s1479_s2 + $0x34] ss:$8 sps:$4 sm:$0xff]   ;;  %v999_v23 = vld [vmem:[%s1478_s1 + $0x70] ss:$8 sps:$4 sm:$0xff]   ;;  %v1038_v24 = vld [vmem:[%s1480_s0 + $0x4] ss:$8 sps:$4 sm:$0xff]  }
   0x9   :  { %v1000_v25 = vld [vmem:[%s1478_s1 + $0x84] ss:$8 sps:$4 sm:$0xff]   ;;  %v1274_v26 = vld [vmem:[%s1479_s2 + $0x30] ss:$8 sps:$4 sm:$0xff]   ;;  %281 = vmatprep.mubr.bf16.mxu0 %v1038_v24  ;;  %v1002_v27 = vld [vmem:[%s1478_s1 + $0x80] ss:$8 sps:$4 sm:$0xff]  }
   0xa   :  { %366 = vmatpush1.bf16.msra.mxu1 %v1235_v17  ;;  %v1003_v28 = vld [vmem:[%s1478_s1 + $0x94] ss:$8 sps:$4 sm:$0xff]   ;;  %v1005_v29 = vld [vmem:[%s1478_s1 + $0x90] ss:$8 sps:$4 sm:$0xff]   ;;  %v1006_v30 = vld [vmem:[%s1478_s1 + $0xa4] ss:$8 sps:$4 sm:$0xff]  }
   0xb   :  { %254 = vmatpush1.bf16.msra.mxu0 %v984_v6  ;;  %367 = vmatprep.subr.bf16.mxu1 %v1241_v18  ;;  %v1008_v31 = vld [vmem:[%s1478_s1 + $0xa0] ss:$8 sps:$4 sm:$0xff]   ;;  %v1009_v32 = vld [vmem:[%s1478_s1 + $0xb4] ss:$8 sps:$4 sm:$0xff]   ;;  %v1011_v33 = vld [vmem:[%s1478_s1 + $0xb0] ss:$8 sps:$4 sm:$0xff]  }
   0xc   :  { %255 = vmatprep.subr.bf16.mxu0 %v985_v7  ;;  %v1014_v34 = vld [vmem:[%s1478_s1 + $0xc4] ss:$8 sps:$4 sm:$0xff]   ;;  %v1017_v35 = vld [vmem:[%s1478_s1 + $0xc0] ss:$8 sps:$4 sm:$0xff]   ;;  %v1020_v36 = vld [vmem:[%s1478_s1 + $0xd4] ss:$8 sps:$4 sm:$0xff]  }
   0xd   :  { %v1023_v37 = vld [vmem:[%s1478_s1 + $0xd0] ss:$8 sps:$4 sm:$0xff]   ;;  %v1026_v38 = vld [vmem:[%s1478_s1 + $0xe4] ss:$8 sps:$4 sm:$0xff]   ;;  %v1029_v39 = vld [vmem:[%s1478_s1 + $0xe0] ss:$8 sps:$4 sm:$0xff]  }
   0xe   :  { %368 = vmatpush1.bf16.msra.mxu1 %v1253_v21  ;;  %v1032_v40 = vld [vmem:[%s1478_s1 + $0xf4] ss:$8 sps:$4 sm:$0xff]   ;;  %v1035_v41 = vld [vmem:[%s1478_s1 + $0xf0] ss:$8 sps:$4 sm:$0xff]   ;;  %v1036_v42 = vld [vmem:[%s1480_s0] ss:$8 sps:$4 sm:$0xff]  }
   0xf   :  { %256 = vmatpush1.bf16.msra.mxu0 %v987_v8  ;;  %369 = vmatprep.subr.bf16.mxu1 %v1259_v22  ;;  %v1329_v48 = vshrl.u32 %v69_v47, 7  ;;  %v67_v50 = vld [vmem:[%s1481_s3] sm:$0x3]  ;;  %s1120_s0 = smov 64   ;;  %vm937_vm1 = vmpackc.low %vm359_vm0, %vm359_vm0  ;;  %vm859_vm7 = vcmask 80896  }
  0x10   :  { %257 = vmatprep.subr.bf16.mxu0 %v988_v9  ;;  %v1039_v8 = vld [vmem:[%s1482_s4] ss:$8 sps:$4 sm:$0xff]   ;;  %v1041_v9 = vld [vmem:[%s1482_s4 + $0x4] ss:$8 sps:$4 sm:$0xff]  }
  0x11   :  { %v71_v49 = vsub.s32 0, %v1329_v48  ;;  %v75_v51 = vsub.s32 1, %v1329_v48  ;;  %v1051_v24 = vld [vmem:[%s1482_s4 + $0x40] ss:$8 sps:$4 sm:$0xff]  }
  0x12   :  { %370 = vmatpush1.bf16.msra.mxu1 %v1274_v26 }
  0x13   :  { %258 = vmatpush1.bf16.msra.mxu0 %v990_v10  ;;  %v72_v52 = vrot.slane %v67_v50, %v71_v49  ;;  %v76_v53 = vrot.slane %v67_v50, %v75_v51  ;;  %v1044_v10 = vld [vmem:[%s1482_s4 + $0x14] ss:$8 sps:$4 sm:$0xff]   ;;  %534 = vmatprep.subr.bf16.mxu1 %v1041_v9 }
  0x14   :  { %259 = vmatprep.subr.bf16.mxu0 %v991_v11  ;;  %v1042_v11 = vld [vmem:[%s1482_s4 + $0x10] ss:$8 sps:$4 sm:$0xff]  }
  0x15   :  { %396 = vmatmul.mubr.bf16.vlgmr.msra.gmra.mrb[0].mxu1 %v1119_v1 }
  0x16   :  { %566 = vmatprep.mubr.bf16.mxu1 %v1119_v1  ;;  %535 = vmatpush1.bf16.msra.mxu1 %v1039_v8 }
  0x17   :  { %260 = vmatpush1.bf16.msra.mxu0 %v993_v13  ;;  %536 = vmatprep.subr.bf16.mxu1 %v1044_v10  ;;  %v1047_v13 = vld [vmem:[%s1482_s4 + $0x24] ss:$8 sps:$4 sm:$0xff]  }
  0x18   :  { %261 = vmatprep.subr.bf16.mxu0 %v994_v16  ;;  %v1045_v16 = vld [vmem:[%s1482_s4 + $0x20] ss:$8 sps:$4 sm:$0xff]  }
  0x1a   :  { %537 = vmatpush1.bf16.msra.mxu1 %v1042_v11 }
  0x1b   :  { %262 = vmatpush1.bf16.msra.mxu0 %v996_v19  ;;  %538 = vmatprep.subr.bf16.mxu1 %v1047_v13  ;;  %v1050_v19 = vld [vmem:[%s1482_s4 + $0x34] ss:$8 sps:$4 sm:$0xff]  }
  0x1c   :  { %263 = vmatprep.subr.bf16.mxu0 %v997_v20  ;;  %v1048_v20 = vld [vmem:[%s1482_s4 + $0x30] ss:$8 sps:$4 sm:$0xff]  }
  0x1e   :  { %539 = vmatpush1.bf16.msra.mxu1 %v1045_v16 }
  0x1f   :  { %264 = vmatpush1.bf16.msra.mxu0 %v999_v23  ;;  %540 = vmatprep.subr.bf16.mxu1 %v1050_v19  ;;  %v1053_v23 = vld [vmem:[%s1482_s4 + $0x44] ss:$8 sps:$4 sm:$0xff]  }
  0x20   :  { %265 = vmatprep.subr.bf16.mxu0 %v1000_v25  ;;  %v1056_v25 = vld [vmem:[%s1482_s4 + $0x54] ss:$8 sps:$4 sm:$0xff]  }
  0x22   :  { %541 = vmatpush1.bf16.msra.mxu1 %v1048_v20 }
  0x23   :  { %266 = vmatpush1.bf16.msra.mxu0 %v1002_v27  ;;  %542 = vmatprep.subr.bf16.mxu1 %v1053_v23  ;;  %v1054_v27 = vld [vmem:[%s1482_s4 + $0x50] ss:$8 sps:$4 sm:$0xff]  }
  0x24   :  { %267 = vmatprep.subr.bf16.mxu0 %v1003_v28  ;;  %v1059_v28 = vld [vmem:[%s1482_s4 + $0x64] ss:$8 sps:$4 sm:$0xff]  }
  0x26   :  { %543 = vmatpush1.bf16.msra.mxu1 %v1051_v24 }
  0x27   :  { %268 = vmatpush1.bf16.msra.mxu0 %v1005_v29  ;;  %544 = vmatprep.subr.bf16.mxu1 %v1056_v25  ;;  %v1057_v29 = vld [vmem:[%s1482_s4 + $0x60] ss:$8 sps:$4 sm:$0xff]  }
  0x28   :  { %269 = vmatprep.subr.bf16.mxu0 %v1006_v30  ;;  %v1062_v30 = vld [vmem:[%s1482_s4 + $0x74] ss:$8 sps:$4 sm:$0xff]  }
  0x2a   :  { %545 = vmatpush1.bf16.msra.mxu1 %v1054_v27 }
  0x2b   :  { %270 = vmatpush1.bf16.msra.mxu0 %v1008_v31  ;;  %546 = vmatprep.subr.bf16.mxu1 %v1059_v28  ;;  %v1060_v31 = vld [vmem:[%s1482_s4 + $0x70] ss:$8 sps:$4 sm:$0xff]  }
  0x2c   :  { %271 = vmatprep.subr.bf16.mxu0 %v1009_v32 }
  0x2e   :  { %547 = vmatpush1.bf16.msra.mxu1 %v1057_v29 }
  0x2f   :  { %272 = vmatpush1.bf16.msra.mxu0 %v1011_v33  ;;  %548 = vmatprep.subr.bf16.mxu1 %v1062_v30 }
  0x30   :  { %273 = vmatprep.subr.bf16.mxu0 %v1014_v34 }
  0x32   :  { %549 = vmatpush1.bf16.msra.mxu1 %v1060_v31 }
  0x33   :  { %274 = vmatpush1.bf16.msra.mxu0 %v1017_v35  ;;  %619 = vmatprep.subr.bf16.mxu1 %v1212_v12 }
  0x34   :  { %275 = vmatprep.subr.bf16.mxu0 %v1020_v36 }
  0x37   :  { %276 = vmatpush1.bf16.msra.mxu0 %v1023_v37 }
  0x38   :  { %277 = vmatprep.subr.bf16.mxu0 %v1026_v38 }
  0x3b   :  { %278 = vmatpush1.bf16.msra.mxu0 %v1029_v39 }
  0x3c   :  { %279 = vmatprep.subr.bf16.mxu0 %v1032_v40 }
  0x3f   :  { %280 = vmatpush1.bf16.msra.mxu0 %v1035_v41 }
  0x40   :  { %698 = vmatprep.subr.bf16.mxu0 %v1041_v9 }
  0x42   :  { %282 = vmatmul.mubr.bf16.vlgmr.msra.gmra.mrb[0].mxu0 %v1036_v42 }
  0x43   :  { %730 = vmatprep.mubr.bf16.mxu0 %v1119_v1  ;;  %699 = vmatpush1.bf16.msra.mxu0 %v1039_v8 }
  0x44   :  { %700 = vmatprep.subr.bf16.mxu0 %v1044_v10 }
  0x47   :  { %701 = vmatpush1.bf16.msra.mxu0 %v1042_v11 }
  0x48   :  { %702 = vmatprep.subr.bf16.mxu0 %v1047_v13 }
  0x4b   :  { %703 = vmatpush1.bf16.msra.mxu0 %v1045_v16 }
  0x4c   :  { %704 = vmatprep.subr.bf16.mxu0 %v1050_v19 }
  0x4f   :  { %705 = vmatpush1.bf16.msra.mxu0 %v1048_v20 }
  0x50   :  { %706 = vmatprep.subr.bf16.mxu0 %v1053_v23 }
  0x53   :  { %707 = vmatpush1.bf16.msra.mxu0 %v1051_v24 }
  0x54   :  { %708 = vmatprep.subr.bf16.mxu0 %v1056_v25 }
  0x57   :  { %709 = vmatpush1.bf16.msra.mxu0 %v1054_v27 }
  0x58   :  { %710 = vmatprep.subr.bf16.mxu0 %v1059_v28 }
  0x5b   :  { %711 = vmatpush1.bf16.msra.mxu0 %v1057_v29 }
  0x5c   :  { %712 = vmatprep.subr.bf16.mxu0 %v1062_v30 }
  0x5f   :  { %713 = vmatpush1.bf16.msra.mxu0 %v1060_v31 }
  0xe8   :  { %v397_v43 = vpop.f32.mrb[0].mxu1 }
  0xe9   :  { %v399_v44 = vpop.f32.mrb[1].mxu1 }
  0xea   :  { %v401_v45 = vpop.f32.mrb[2].mxu1 }
  0xeb   :  { %v402_v46 = vpop.f32.mrb[3].mxu1 }
 0x115   :  { %v283_v54 = vpop.f32.mrb[0].mxu0 }
 0x116   :  { %v284_v55 = vadd.f32 %v283_v54, %v72_v52  ;;  %v285_v56 = vpop.f32.mrb[1].mxu0 }
 0x117   :  { %v286_v57 = vadd.f32 %v285_v56, %v76_v53  ;;  %v287_v58 = vpop.f32.mrb[2].mxu0 }
 0x118   :  { %v404_v59 = vadd.f32 %v397_v43, %v284_v55  ;;  %v1340_v60 = vadd.f32 %v287_v58, %v72_v52  ;;  %v289_v61 = vpop.f32.mrb[3].mxu0 }
 0x119   :  { %v1342_v62 = vadd.f32 %v399_v44, %v286_v57  ;;  %v1344_v63 = vadd.f32 %v289_v61, %v76_v53 }
 0x11a   :  { %v919_v2 = vmul.f32 -1.442695, %v404_v59 }
 0x11b   :  { %1067 = vtanh.f32 %v1342_v62  ;;  %v920_v36 = vmul.f32 -1.442695, %v1342_v62 }
 0x11c   :  { %1069 = vpow2.f32 %v919_v2 }
 0x125   :  { %v1068_v0 = vpop.eup %1067 }
 0x126   :  { %421 = vrot.lane.b32.xlu0 %v1068_v0, %s1120_s0  ;;  %v1070_v3 = vpop.eup %1069 }
 0x127   :  { %v412_v4 = vadd.f32 1.0, %v1070_v3 }
 0x129   :  { %1071 = vrcp.f32 %v412_v4 }
 0x133   :  { %v1072_v5 = vpop.eup %1071 }
 0x134   :  { %v419_v32 = vmul.f32 0.0, %v1072_v5 }
 0x198   :  { %v422_v6 = vpop.permute.xlu0 %421 }
 0x199   :  { %v424_v7 = vmul.f32 %v1072_v5, %v422_v6 }
 0x19b   :  { %426 = vrot.lane.b32.xlu0 %v424_v7, %s1120_s0 }
 0x20d   :  { %v427_v33 = vpop.permute.xlu0 %426 }
 0x20e   :  { %v1398_v34 = vadd.f32 %v427_v33, %v419_v32 }
 0x210   :  { %1073 = vtanh.f32 %v1398_v34 }
 0x211   :  { %1075 = vpow2.f32 %v920_v36 }
 0x21a   :  { %v1074_v35 = vpop.eup %1073 }
 0x21b   :  { %432 = vrot.lane.b32.xlu1 %v1074_v35, %s1120_s0  ;;  %v1076_v37 = vpop.eup %1075 }
 0x21c   :  { %v413_v38 = vadd.f32 1.0, %v1076_v37  ;;  %v296_v37 = vld [vmem:[%s1484_s6] sm:$0xff] }
 0x21d   :  { %vm605_vm2 = vcmp.eq.s32.totalorder %v296_v37, 1  ;;  %vm769_vm3 = vcmp.eq.s32.totalorder %v296_v37, 2 }
 0x21e   :  { %1077 = vrcp.f32 %v413_v38 }
 0x228   :  { %v1078_v39 = vpop.eup %1077 }
 0x28d   :  { %v433_v40 = vpop.permute.xlu1 %432 }
 0x28e   :  { %v435_v41 = vmul.f32 %v1078_v39, %v433_v40  ;;  %v606_v39 = vsel %vm605_vm2, 1, %v1119_v1 }
 0x290   :  { %v938_v12 = vpack.c.bf16 %v435_v41, %v435_v41 }
 0x292   :  { %939 = vmatmul.mubr.msk.bf16.vlgmr.msra.gmra.mrb[4].mxu1 %vm937_vm1, %v938_v12 }
 0x293   :  { %620 = vmatpush1.bf16.msra.mxu1 %v1221_v14  ;;  %651 = vmatprep.mubr.bf16.mxu1 %v1119_v1  ;;  %v297_v14 = vld [vmem:[%s1483_s5] sm:$0x3] }
 0x294   :  { %621 = vmatprep.subr.bf16.mxu1 %v1226_v15  ;;  %v1419_v42 = vrot.slane %v297_v14, %v75_v51  ;;  %v1428_v52 = vrot.slane %v297_v14, %v71_v49 }
 0x297   :  { %622 = vmatpush1.bf16.msra.mxu1 %v1235_v17 }
 0x298   :  { %623 = vmatprep.subr.bf16.mxu1 %v1241_v18 }
 0x29b   :  { %624 = vmatpush1.bf16.msra.mxu1 %v1253_v21 }
 0x29c   :  { %625 = vmatprep.subr.bf16.mxu1 %v1259_v22 }
 0x29f   :  { %626 = vmatpush1.bf16.msra.mxu1 %v1274_v26 }
 0x2a2   :  { %942 = vmatmul.mubr.msk.bf16.vlgmr.msra.gmra.mrb[8].mxu1 %vm359_vm0, %v938_v12 }
 0x365   :  { %v568_v15 = vpop.f32.mrb[4].mxu1 }
 0x366   :  { %v570_v17 = vpop.f32.mrb[5].mxu1  ;;  %v569_v53 = vadd.f32 %v568_v15, %v1428_v52 }
 0x367   :  { %v571_v18 = vadd.f32 %v570_v17, %v1419_v42  ;;  %v572_v43 = vpop.f32.mrb[6].mxu1 }
 0x368   :  { %v573_v21 = vpop.f32.mrb[7].mxu1  ;;  %v940_v54 = vmul.f32 -1.442695, %v569_v53  ;;  %v1121_v43 = vmov 0.0  }
 0x369   :  { %1079 = vtanh.f32 %v571_v18  ;;  %v941_v9 = vmul.f32 -1.442695, %v571_v18  ;;  %v770_v18 = vsel %vm769_vm3, 1, %v1119_v1  ;;  %958 = vmatprep.subr.bf16.mxu1 %v1121_v43  ;;  %v1063_v21 = vld [vmem:[%s1485_s7] sm:$0xff]   ;;  %966 = vmatprep.mubr.msk.bf16.mxu1 %vm1122_vm4, %v1121_v43 }
 0x36a   :  { %959 = vmatpush3.bf16.msra.mxu1 %v1063_v21 }
 0x36b   :  { %960 = vmatprep.subr.bf16.mxu1 %v1121_v43 }
 0x373   :  { %v1080_v22 = vpop.eup %1079 }
 0x374   :  { %590 = vrot.lane.b32.xlu1 %v1080_v22, %s1120_s0  ;;  %v1064_v22 = vld [vmem:[%s1485_s7 + $0x8] sm:$0xff]  }
 0x375   :  { %v653_v26 = vpop.f32.mrb[8].mxu1  ;;  %961 = vmatpush3.bf16.msra.mxu1 %v1064_v22 }
 0x376   :  { %v660_v44 = vadd.f32 %v653_v26, %v1340_v60  ;;  %v655_v45 = vpop.f32.mrb[9].mxu1  ;;  %v1065_v26 = vld [vmem:[%s1485_s7 + $0x10] sm:$0xff]   ;;  %962 = vmatprep.subr.bf16.mxu1 %v1121_v43 }
 0x377   :  { %v661_v46 = vadd.f32 %v655_v45, %v1344_v63  ;;  %v657_v47 = vpop.f32.mrb[10].mxu1 }
 0x378   :  { %v658_v50 = vpop.f32.mrb[11].mxu1  ;;  %v943_v56 = vmul.f32 -1.442695, %v660_v44 }
 0x379   :  { %1081 = vtanh.f32 %v661_v46  ;;  %v944_v20 = vmul.f32 -1.442695, %v661_v46  ;;  %963 = vmatpush3.bf16.msra.mxu1 %v1065_v26  ;;  %v1066_v46 = vld [vmem:[%s1485_s7 + $0x18] sm:$0xff]  }
 0x37a   :  { %1083 = vpow2.f32 %v940_v54  ;;  %964 = vmatprep.subr.bf16.mxu1 %v1121_v43 }
 0x37b   :  { %1085 = vpow2.f32 %v943_v56 }
 0x37d   :  { %965 = vmatpush3.bf16.msra.mxu1 %v1066_v46 }
 0x383   :  { %v1082_v51 = vpop.eup %1081 }
 0x384   :  { %677 = vrot.lane.b32.xlu0 %v1082_v51, %s1120_s0  ;;  %v1084_v55 = vpop.eup %1083 }
 0x385   :  { %v581_v57 = vadd.f32 1.0, %v1084_v55  ;;  %v1086_v58 = vpop.eup %1085 }
 0x386   :  { %v668_v62 = vadd.f32 1.0, %v1086_v58 }
 0x387   :  { %1087 = vrcp.f32 %v581_v57 }
 0x388   :  { %1089 = vrcp.f32 %v668_v62 }
 0x391   :  { %v1088_v59 = vpop.eup %1087 }
 0x392   :  { %v1090_v48 = vpop.eup %1089  ;;  %v588_v0 = vmul.f32 0.0, %v1088_v59 }
 0x393   :  { %v675_v5 = vmul.f32 %v1090_v48, %v1398_v34 }
 0x3e6   :  { %v591_v60 = vpop.permute.xlu1 %590 }
 0x3e7   :  { %v593_v61 = vmul.f32 %v1088_v59, %v591_v60 }
 0x3e9   :  { %595 = vrot.lane.b32.xlu1 %v593_v61, %s1120_s0  ;;  %v947_v61 = vld [vmem:[%s1486_s8] ss:$0 sm:$0xff] }
 0x3f6   :  { %v678_v49 = vpop.permute.xlu0 %677 }
 0x3f7   :  { %v680_v63 = vmul.f32 %v1090_v48, %v678_v49 }
 0x3f9   :  { %682 = vrot.lane.b32.xlu0 %v680_v63, %s1120_s0 }
 0x45b   :  { %v596_v2 = vpop.permute.xlu1 %595 }
 0x45c   :  { %v1433_v3 = vadd.f32 %v596_v2, %v588_v0 }
 0x45e   :  { %1091 = vtanh.f32 %v1433_v3 }
 0x468   :  { %v1092_v4 = vpop.eup %1091 }
 0x469   :  { %601 = vrot.lane.b32.xlu1 %v1092_v4, %s1120_s0 }
 0x46b   :  { %v683_v6 = vpop.permute.xlu0 %682 }
 0x46c   :  { %v685_v7 = vadd.f32 %v683_v6, %v675_v5 }
 0x46e   :  { %1093 = vtanh.f32 %v685_v7 }
 0x46f   :  { %1095 = vpow2.f32 %v941_v9 }
 0x478   :  { %v1094_v8 = vpop.eup %1093 }
 0x479   :  { %688 = vrot.lane.b32.xlu0 %v1094_v8, %s1120_s0  ;;  %v1096_v10 = vpop.eup %1095 }
 0x47a   :  { %v582_v11 = vadd.f32 1.0, %v1096_v10 }
 0x47c   :  { %1097 = vrcp.f32 %v582_v11 }
 0x47d   :  { %1099 = vpow2.f32 %v944_v20 }
 0x486   :  { %v1098_v13 = vpop.eup %1097 }
 0x487   :  { %v1100_v23 = vpop.eup %1099 }
 0x488   :  { %v669_v24 = vadd.f32 1.0, %v1100_v23 }
 0x48a   :  { %1101 = vrcp.f32 %v669_v24 }
 0x494   :  { %v1102_v27 = vpop.eup %1101 }
 0x4db   :  { %v602_v16 = vpop.permute.xlu1 %601 }
 0x4dc   :  { %v1439_v19 = vmul.f32 %v1098_v13, %v602_v16 }
 0x4de   :  { %693 = vrot.lane.b32.xlu1 %v1439_v19, %s1120_s0 }
 0x4eb   :  { %v689_v25 = vpop.permute.xlu0 %688 }
 0x4ec   :  { %v691_v28 = vmul.f32 %v1102_v27, %v689_v25 }
 0x550   :  { %v694_v29 = vpop.permute.xlu1 %693 }
 0x551   :  { %v696_v30 = vsel %vm359_vm0, %v691_v28, %v694_v29 }
 0x552   :  { %v697_v31 = vpack.c.bf16 %v696_v30, %v696_v30 }
 0x554   :  { %731 = vmatmul.mubr.bf16.vlgmr.msra.gmra.mrb[4].mxu0 %v697_v31 }
 0x627   :  { %v732_v32 = vpop.f32.mrb[4].mxu0 }
 0x628   :  { %v734_v33 = vpop.f32.mrb[5].mxu0  ;;  %v733_v40 = vadd.f32 %v732_v32, %v1428_v52 }
 0x629   :  { %v735_v34 = vadd.f32 %v734_v33, %v1419_v42  ;;  %v736_v35 = vpop.f32.mrb[6].mxu0 }
 0x62a   :  { %v737_v36 = vpop.f32.mrb[7].mxu0  ;;  %v945_v41 = vmul.f32 -1.442695, %v733_v40 }
 0x62b   :  { %1103 = vtanh.f32 %v735_v34  ;;  %v946_v50 = vmul.f32 -1.442695, %v735_v34 }
 0x62c   :  { %1105 = vpow2.f32 %v945_v41 }
 0x635   :  { %v1104_v38 = vpop.eup %1103 }
 0x636   :  { %754 = vrot.lane.b32.xlu0 %v1104_v38, %s1120_s0  ;;  %v1106_v12 = vpop.eup %1105 }
 0x637   :  { %v745_v14 = vadd.f32 1.0, %v1106_v12 }
 0x639   :  { %1107 = vrcp.f32 %v745_v14 }
 0x63a   :  { %608 = vperm.xlu0 %974, %v606_v39  }
 0x643   :  { %v1108_v42 = vpop.eup %1107 }
 0x644   :  { %v752_v1 = vmul.f32 %v1108_v42, %v1433_v3 }
 0x6a8   :  { %v755_v15 = vpop.permute.xlu0 %754 }
 0x6a9   :  { %v757_v17 = vmul.f32 %v1108_v42, %v755_v15 }
 0x6ab   :  { %759 = vrot.lane.b32.xlu1 %v757_v17, %s1120_s0 }
 0x6af   :  { %772 = vperm.xlu1 %975, %v770_v18  }
 0x6b9   :  { %v609_v54 = vpop.permute.xlu0 %608 }
 0x6ba   :  { %vm610_vm5 = vcmp.eq.s32.totalorder %v609_v54, 1 }
 0x6bb   :  { %v611_v58 = vsel %vm610_vm5, %v1439_v19, 0.0 }
 0x71d   :  { %v760_v44 = vpop.permute.xlu1 %759 }
 0x71e   :  { %v762_v45 = vadd.f32 %v760_v44, %v752_v1 }
 0x720   :  { %1109 = vtanh.f32 %v762_v45 }
 0x721   :  { %1111 = vpow2.f32 %v946_v50 }
 0x72a   :  { %v1110_v47 = vpop.eup %1109 }
 0x72b   :  { %765 = vrot.lane.b32.xlu1 %v1110_v47, %s1120_s0  ;;  %v1112_v51 = vpop.eup %1111 }
 0x72c   :  { %v746_v52 = vadd.f32 1.0, %v1112_v51 }
 0x72e   :  { %1113 = vrcp.f32 %v746_v52  ;;  %v773_v53 = vpop.permute.xlu1 %772 }
 0x72f   :  { %vm774_vm6 = vcmp.eq.s32.totalorder %v773_v53, 1 }
 0x738   :  { %v1114_v55 = vpop.eup %1113 }
 0x79d   :  { %v766_v56 = vpop.permute.xlu1 %765 }
 0x79e   :  { %v768_v57 = vmul.f32 %v1114_v55, %v766_v56 }
 0x7a0   :  { %v775_v59 = vsel %vm774_vm6, %v768_v57, %v611_v58 }
 0x7a1   :  { %v776_v60 = vpack.c.bf16 %v775_v59, %v775_v59 }
 0x7a3   :  { %967 = vmatmul.mubr.msk.bf16.vlgmr.msra.gmra.mrb[12].mxu1 %vm359_vm0, %v776_v60 }
 0x876   :  { %v853_v62 = vpop.f32.mrb[12].mxu1 }
 0x877   :  { %v854_v48 = vadd.f32 %v947_v61, %v853_v62  ;;  %v968_v49 = vpop.f32.mrb[13].mxu1 }
 0x878   :  { %v856_v63 = vpop.f32.mrb[14].mxu1 }
 0x879   :  { %v969_v0 = vpop.f32.mrb[15].mxu1  ;;  %v860_v2 = vsel %vm859_vm7, %v854_v48, -inf }
 0x87a   :  { %861 = vmax.xlane.f32.xlu0 %v860_v2 }
 0x907   :  { %v862_v3 = vpop.xlane.xlu0 %861 }
 0x908   :  { %v863_v4 = vsub.f32 %v854_v48, %v862_v3 }
 0x90a   :  { %v864_v5 = vmul.f32 1.442695, %v863_v4 }
 0x90c   :  { %1115 = vpow2.f32 %v864_v5 }
 0x916   :  { %v1116_v6 = vpop.eup %1115 }
 0x917   :  { %v866_v7 = vsel %vm859_vm7, %v1116_v6, 0.0 }
 0x918   :  { %867 = vadd.xlane.f32.xlu1 %v866_v7 }
 0x9a5   :  { %v868_v8 = vpop.xlane.xlu1 %867 }
 0x9a6   :  { %1117 = vlog2.f32 %v868_v8 }
 0x9b0   :  { %v1118_v9 = vpop.eup %1117 }
 0x9b1   :  { %v870_v10 = vmul.f32 0.6931472, %v1118_v9 }
 0x9b3   :  { %v871_v11 = vsub.f32 %v863_v4, %v870_v10 }
 0x9b5   :  { %872 = vst.msk [vmem:[%s1487_s9] sm:$0xff] %vm859_vm7, %v871_v11 }

</bundles_post_ra>
